<compile_context>
chip_gen: v7x
topology: tpu7x:2x2x1
jax: 0.10.0
libtpu: 0.0.40
codegen_flags: <defaults>
</compile_context>

<pallas_src>
import functools

import jax
import jax.numpy as jnp
from jax.experimental import pallas as pl
from jax.experimental.pallas import tpu as pltpu

_INV_SQRT2 = 0.7071067811865476
_SQRT_2_OVER_PI = 0.7978845608028654

_PREFER_SINGLE_BUFFER = hasattr(pl, "Buffered")


def _round_up(v, m):
    return ((v + m - 1) // m) * m


def _cdiv(a, b):
    return -(-a // b)


def _gelu(h, approximate):
    if approximate:
        # tanh-approx GELU: jnp.tanh runs on the EUP (separate VLIW slot).
        return 0.5 * h * (1.0 + jnp.tanh(_SQRT_2_OVER_PI * (h + 0.044715 * h * h * h)))
    # Exact erf GELU, matches PyTorch's default nn.GELU().
    return 0.5 * h * (1.0 + jax.lax.erf(h * _INV_SQRT2))


# ---------------------------------------------------------------------------
# Kernels
# ---------------------------------------------------------------------------
def _mlp_fused_kernel(*refs, num_layers, final_relu, approx_gelu):
    """refs = (x_ref, w0, b0, w1, b1, ..., o_ref). Whole MLP on one row tile;
    intermediates never leave vregs/VMEM."""
    x_ref, o_ref = refs[0], refs[-1]
    wb = refs[1:-1]

    h = x_ref[...]
    for l in range(num_layers):
        w_ref, b_ref = wb[2 * l], wb[2 * l + 1]
        lhs = h if h.dtype == w_ref.dtype else h.astype(w_ref.dtype)
        h = jnp.dot(lhs, w_ref[...], preferred_element_type=jnp.float32)
        h = h + b_ref[...].astype(jnp.float32)
        if l < num_layers - 1:
            h = _gelu(h, approx_gelu)
    if final_relu:
        h = jnp.maximum(h, 0.0)
    o_ref[...] = h.astype(o_ref.dtype)


def _layer_kernel(x_ref, w_ref, b_ref, o_ref, *, act, approx_gelu):
    """One Linear (+ activation) on a row tile; used by the VMEM fallback."""
    lhs = x_ref[...]
    if lhs.dtype != w_ref.dtype:
        lhs = lhs.astype(w_ref.dtype)
    h = jnp.dot(lhs, w_ref[...], preferred_element_type=jnp.float32)
    h = h + b_ref[...].astype(jnp.float32)
    if act == "gelu":
        h = _gelu(h, approx_gelu)
    elif act == "relu":
        h = jnp.maximum(h, 0.0)
    o_ref[...] = h.astype(o_ref.dtype)


# ---------------------------------------------------------------------------
# Wrapper
# ---------------------------------------------------------------------------
def _resident_spec(shape, single_buffer):
    """Full-array block, constant index_map -> stays resident in VMEM.
    Single-buffered when supported: it is fetched exactly once."""
    index_map = lambda i: (0,) * len(shape)
    if single_buffer:
        return pl.BlockSpec(shape, index_map, pipeline_mode=pl.Buffered(1))
    return pl.BlockSpec(shape, index_map)


def _vmem_budget_bytes():
    cap = 64 << 20  # conservative default: v7x has 64 MiB VMEM per TensorCore
    try:
        cap = int(getattr(pltpu.get_tpu_info(), "vmem_capacity_bytes", cap))
    except Exception:
        pass
    return max(32 << 20, (cap * 3) // 4)


def _row_tiling(n, tile_rows):
    num_tiles = max(1, _cdiv(n, tile_rows))
    if num_tiles == 1 and n > 8:
        num_tiles = 2  # give v7x's two TensorCores one parallel step each
    tn = _round_up(_cdiv(n, num_tiles), 8)
    return tn, num_tiles * tn


def make_mlp(params, in_dim, hidden_list, *, tile_rows=512, approx_gelu=False):
    """One-time prep (weight padding) + a forward closure.

    params: list of (W[in, out], b[out]) JAX arrays (nn.Linear weights already
    transposed to [in, out]). hidden_list=None means Linear -> ReLU.
    """
    num_layers = len(params)
    final_relu = hidden_list is None

    # Feature dims: x keeps its native last dim; every later feature dim is
    # padded to a multiple of 128. Zero padding is exact (GELU(0)=0, ReLU(0)=0,
    # padded weight rows/cols and bias entries are zero); padded output columns
    # are sliced off.
    dims = [in_dim] + [w.shape[1] for (w, _) in params]
    pdims = [in_dim] + [_round_up(d, 128) for d in dims[1:]]

    padded = []  # padded ONCE, reused every forward (no per-call jnp.pad of W/b)
    for l, (w, b) in enumerate(params):
        din, dout = w.shape
        w_p = jnp.pad(w, ((0, pdims[l] - din), (0, pdims[l + 1] - dout)))
        b_p = jnp.pad(b.reshape(1, -1), ((0, 0), (0, pdims[l + 1] - dout)))
        padded.append((w_p, b_p))

    weight_bytes_raw = sum(
        (w_p.size + b_p.size) * w_p.dtype.itemsize for (w_p, b_p) in padded
    )
    budget = _vmem_budget_bytes()

    def _compiler_params(vmem_limit):
        return pltpu.CompilerParams(
            dimension_semantics=("parallel",),  # row tiles are independent
            vmem_limit_bytes=int(vmem_limit),
        )

    def forward(x):
        n = x.shape[0]
        out_dtype = x.dtype
        tn, n_pad = _row_tiling(n, tile_rows)
        x_p = x if n_pad == n else jnp.pad(x, ((0, n_pad - n), (0, 0)))

        def run(single_buffer):
            wbuf = 1 if single_buffer else 2
            # Rough resident-VMEM estimate for the fused (all-layers) path.
            act_bytes = 2 * tn * dims[0] * x.dtype.itemsize
            out_bytes = 2 * tn * pdims[-1] * jnp.dtype(out_dtype).itemsize
            inter_bytes = 2 * tn * max(pdims) * 4  # headroom for f32 intermediates
            needed = wbuf * weight_bytes_raw + act_bytes + out_bytes + inter_bytes

            if needed <= budget:
                vmem_limit = min(budget, max(32 << 20, needed + needed // 4 + (2 << 20)))
                args = [x_p]
                in_specs = [pl.BlockSpec((tn, dims[0]), lambda i: (i, 0))]
                for (w_p, b_p) in padded:
                    args += [w_p, b_p]
                    in_specs += [
                        _resident_spec(w_p.shape, single_buffer),
                        _resident_spec(b_p.shape, single_buffer),
                    ]
                kernel = functools.partial(
                    _mlp_fused_kernel,
                    num_layers=num_layers,
                    final_relu=final_relu,
                    approx_gelu=approx_gelu,
                )
                return pl.pallas_call(
                    kernel,
                    out_shape=jax.ShapeDtypeStruct((n_pad, pdims[-1]), out_dtype),
                    grid=(n_pad // tn,),
                    in_specs=in_specs,
                    out_specs=pl.BlockSpec((tn, pdims[-1]), lambda i: (i, 0)),
                    compiler_params=_compiler_params(vmem_limit),
                )(*args)

            # Fallback: one pallas_call per layer -> only one layer's weights
            # resident at a time (needed once all-resident weights exceed the
            # VMEM budget, most relevant on v7x's 64 MiB).
            # TODO(synk): add a K/N-tiled matmul fallback for a single layer
            # whose padded weight alone exceeds the VMEM budget.
            h = x_p
            for l, (w_p, b_p) in enumerate(padded):
                if l < num_layers - 1:
                    act = "gelu"
                elif final_relu:
                    act = "relu"
                else:
                    act = "none"
                layer_dtype = out_dtype if l == num_layers - 1 else jnp.float32
                layer_needed = (
                    wbuf * (w_p.size + b_p.size) * w_p.dtype.itemsize
                    + 2 * tn * h.shape[1] * h.dtype.itemsize
                    + 2 * tn * w_p.shape[1] * jnp.dtype(layer_dtype).itemsize
                )
                vmem_limit = min(
                    budget, max(32 << 20, layer_needed + layer_needed // 4 + (2 << 20))
                )
                kernel = functools.partial(
                    _layer_kernel, act=act, approx_gelu=approx_gelu
                )
                h = pl.pallas_call(
                    kernel,
                    out_shape=jax.ShapeDtypeStruct((n_pad, w_p.shape[1]), layer_dtype),
                    grid=(n_pad // tn,),
                    in_specs=[
                        pl.BlockSpec((tn, h.shape[1]), lambda i: (i, 0)),
                        _resident_spec(w_p.shape, single_buffer),
                        _resident_spec(b_p.shape, single_buffer),
                    ],
                    out_specs=pl.BlockSpec((tn, w_p.shape[1]), lambda i: (i, 0)),
                    compiler_params=_compiler_params(vmem_limit),
                )(h, w_p, b_p)
            return h

        try:
            out_p = run(_PREFER_SINGLE_BUFFER)
        except Exception:
            if not _PREFER_SINGLE_BUFFER:
                raise
            out_p = run(False)  # retry with default double-buffered weight blocks

        if n_pad != n or pdims[-1] != dims[-1]:
            out_p = out_p[:n, : dims[-1]]
        return out_p

    return forward


# ---------------------------------------------------------------------------
# Parameter init (nn.Linear-style) and pure-JAX reference
# ---------------------------------------------------------------------------
def init_mlp_params(key, in_dim, out_dim, hidden_list, dtype=jnp.float32):
    if hidden_list is None:
        shapes = [(in_dim, out_dim)]
    else:
        shapes, lastv = [], in_dim
        for hidden in hidden_list:
            shapes.append((lastv, hidden))
            lastv = hidden
        shapes.append((lastv, out_dim))
    params = []
    for (din, dout) in shapes:
        key, kw, kb = jax.random.split(key, 3)
        bound = float(1.0 / (din ** 0.5))
        w = jax.random.uniform(kw, (din, dout), dtype, -bound, bound)
        b = jax.random.uniform(kb, (dout,), dtype, -bound, bound)
        params.append((w, b))
    return params


def _reference(x, params, hidden_list):
    if hidden_list is None:
        (w, b), = params
        return jnp.maximum(x @ w + b, 0.0)
    h = x
    for (w, b) in params[:-1]:
        h = jax.nn.gelu(h @ w + b, approximate=False)
    w, b = params[-1]
    return h @ w + b


if __name__ == "__main__":
    key = jax.random.PRNGKey(0)
    kx1, kp1, kx2, kp2 = jax.random.split(key, 4)

    # Case 1: hidden_list path (Linear -> GELU -> Linear -> GELU -> Linear),
    # batch chosen so the row-tiled grid has 2 parallel steps with minimal padding.
    batch, in_dim, hidden_list, out_dim = 300, 32, [64, 32], 16
    x = jax.random.normal(kx1, (batch, in_dim), jnp.float32)
    params = init_mlp_params(kp1, in_dim, out_dim, hidden_list)
    mlp = make_mlp(params, in_dim, hidden_list)
    y = jax.block_until_ready(mlp(x))
    assert y.shape == (batch, out_dim), y.shape
    ref = _reference(x, params, hidden_list)
    assert jnp.allclose(y, ref, atol=2e-5, rtol=2e-5), float(jnp.max(jnp.abs(y - ref)))

    # Case 2: hidden_list=None path (Linear -> ReLU), small batch still split
    # into 2 parallel grid steps.
    batch2, in_dim2, out_dim2 = 16, 32, 16
    x2 = jax.random.normal(kx2, (batch2, in_dim2), jnp.float32)
    params2 = init_mlp_params(kp2, in_dim2, out_dim2, None)
    mlp2 = make_mlp(params2, in_dim2, None)
    y2 = jax.block_until_ready(mlp2(x2))
    assert y2.shape == (batch2, out_dim2), y2.shape
    ref2 = _reference(x2, params2, None)
    assert jnp.allclose(y2, ref2, atol=2e-5, rtol=2e-5), float(jnp.max(jnp.abs(y2 - ref2)))

    print("KERNEL_OK")
</pallas_src>

<mosaic_0001>
module attributes {stable_mosaic.version = 11 : i64} {
  func.func @_mlp_fused_kernel(%arg0: i32, %arg1: memref<152x32xf32, #tpu.memory_space<vmem>>, %arg2: memref<32x128xf32, #tpu.memory_space<vmem>>, %arg3: memref<1x128xf32, #tpu.memory_space<vmem>>, %arg4: memref<128x128xf32, #tpu.memory_space<vmem>>, %arg5: memref<1x128xf32, #tpu.memory_space<vmem>>, %arg6: memref<128x128xf32, #tpu.memory_space<vmem>>, %arg7: memref<1x128xf32, #tpu.memory_space<vmem>>, %arg8: memref<152x128xf32, #tpu.memory_space<vmem>>) attributes {dimension_semantics = [#tpu.dimension_semantics<parallel>], iteration_bounds = array<i64: 2>, scalar_prefetch = 0 : i64, scratch_operands = 0 : i64, tpu.core_type = #tpu.core_type<tc>, window_params = [{transform_indices = @transform_0, window_bounds = array<i64: 152, 32>}, {pipeline_mode = #tpu.pipeline_mode<synchronous>, transform_indices = @transform_1, window_bounds = array<i64: 32, 128>}, {pipeline_mode = #tpu.pipeline_mode<synchronous>, transform_indices = @transform_2, window_bounds = array<i64: 1, 128>}, {pipeline_mode = #tpu.pipeline_mode<synchronous>, transform_indices = @transform_3, window_bounds = array<i64: 128, 128>}, {pipeline_mode = #tpu.pipeline_mode<synchronous>, transform_indices = @transform_4, window_bounds = array<i64: 1, 128>}, {pipeline_mode = #tpu.pipeline_mode<synchronous>, transform_indices = @transform_5, window_bounds = array<i64: 128, 128>}, {pipeline_mode = #tpu.pipeline_mode<synchronous>, transform_indices = @transform_6, window_bounds = array<i64: 1, 128>}, {transform_indices = @transform_7, window_bounds = array<i64: 152, 128>}]} {
    %c0 = arith.constant 0 : index
    %c0_0 = arith.constant 0 : index
    %0 = vector.load %arg1[%c0, %c0_0] : memref<152x32xf32, #tpu.memory_space<vmem>>, vector<152x32xf32>
    %c0_1 = arith.constant 0 : index
    %c0_2 = arith.constant 0 : index
    %1 = vector.load %arg2[%c0_1, %c0_2] : memref<32x128xf32, #tpu.memory_space<vmem>>, vector<32x128xf32>
    %cst = arith.constant dense<0.000000e+00> : vector<152x128xf32>
    %2 = tpu.matmul %0, %1, %cst {dimension_numbers = #tpu.dot_dimension_numbers<[1], [0], [0], [1], [0, 0, 1, 1], [], []>} : vector<152x32xf32>, vector<32x128xf32>, vector<152x128xf32> -> vector<152x128xf32>
    %c0_3 = arith.constant 0 : index
    %c0_4 = arith.constant 0 : index
    %3 = vector.load %arg3[%c0_3, %c0_4] : memref<1x128xf32, #tpu.memory_space<vmem>>, vector<1x128xf32>
    %4 = vector.broadcast %3 : vector<1x128xf32> to vector<152x128xf32>
    %5 = arith.addf %2, %4 : vector<152x128xf32>
    %cst_5 = arith.constant 5.000000e-01 : f32
    %6 = vector.broadcast %cst_5 : f32 to vector<152x128xf32>
    %7 = arith.mulf %6, %5 : vector<152x128xf32>
    %cst_6 = arith.constant 0.707106769 : f32
    %8 = vector.broadcast %cst_6 : f32 to vector<152x128xf32>
    %9 = arith.mulf %5, %8 : vector<152x128xf32>
    %10 = math.erf %9 : vector<152x128xf32>
    %cst_7 = arith.constant 1.000000e+00 : f32
    %11 = vector.broadcast %cst_7 : f32 to vector<152x128xf32>
    %12 = arith.addf %11, %10 : vector<152x128xf32>
    %13 = arith.mulf %7, %12 : vector<152x128xf32>
    %c0_8 = arith.constant 0 : index
    %c0_9 = arith.constant 0 : index
    %14 = vector.load %arg4[%c0_8, %c0_9] : memref<128x128xf32, #tpu.memory_space<vmem>>, vector<128x128xf32>
    %cst_10 = arith.constant dense<0.000000e+00> : vector<152x128xf32>
    %15 = tpu.matmul %13, %14, %cst_10 {dimension_numbers = #tpu.dot_dimension_numbers<[1], [0], [0], [1], [0, 0, 1, 1], [], []>} : vector<152x128xf32>, vector<128x128xf32>, vector<152x128xf32> -> vector<152x128xf32>
    %c0_11 = arith.constant 0 : index
    %c0_12 = arith.constant 0 : index
    %16 = vector.load %arg5[%c0_11, %c0_12] : memref<1x128xf32, #tpu.memory_space<vmem>>, vector<1x128xf32>
    %17 = vector.broadcast %16 : vector<1x128xf32> to vector<152x128xf32>
    %18 = arith.addf %15, %17 : vector<152x128xf32>
    %cst_13 = arith.constant 5.000000e-01 : f32
    %19 = vector.broadcast %cst_13 : f32 to vector<152x128xf32>
    %20 = arith.mulf %19, %18 : vector<152x128xf32>
    %cst_14 = arith.constant 0.707106769 : f32
    %21 = vector.broadcast %cst_14 : f32 to vector<152x128xf32>
    %22 = arith.mulf %18, %21 : vector<152x128xf32>
    %23 = math.erf %22 : vector<152x128xf32>
    %cst_15 = arith.constant 1.000000e+00 : f32
    %24 = vector.broadcast %cst_15 : f32 to vector<152x128xf32>
    %25 = arith.addf %24, %23 : vector<152x128xf32>
    %26 = arith.mulf %20, %25 : vector<152x128xf32>
    %c0_16 = arith.constant 0 : index
    %c0_17 = arith.constant 0 : index
    %27 = vector.load %arg6[%c0_16, %c0_17] : memref<128x128xf32, #tpu.memory_space<vmem>>, vector<128x128xf32>
    %cst_18 = arith.constant dense<0.000000e+00> : vector<152x128xf32>
    %28 = tpu.matmul %26, %27, %cst_18 {dimension_numbers = #tpu.dot_dimension_numbers<[1], [0], [0], [1], [0, 0, 1, 1], [], []>} : vector<152x128xf32>, vector<128x128xf32>, vector<152x128xf32> -> vector<152x128xf32>
    %c0_19 = arith.constant 0 : index
    %c0_20 = arith.constant 0 : index
    %29 = vector.load %arg7[%c0_19, %c0_20] : memref<1x128xf32, #tpu.memory_space<vmem>>, vector<1x128xf32>
    %30 = vector.broadcast %29 : vector<1x128xf32> to vector<152x128xf32>
    %31 = arith.addf %28, %30 : vector<152x128xf32>
    %c0_21 = arith.constant 0 : index
    %c0_22 = arith.constant 0 : index
    %32 = vector.load %arg8[%c0_21, %c0_22] : memref<152x128xf32, #tpu.memory_space<vmem>>, vector<152x128xf32>
    tpu.vector_store %arg8[%c0_21, %c0_22], %31 {strides = array<i32>} : memref<152x128xf32, #tpu.memory_space<vmem>>, vector<152x128xf32>,
    return
  }
  func.func @transform_0(%arg0: i32) -> (i32, i32) {
    %c0_i32 = arith.constant 0 : i32
    %c0_i32_0 = arith.constant 0 : i32
    return %arg0, %c0_i32 : i32, i32
  }
  func.func @transform_1(%arg0: i32) -> (i32, i32) {
    %c0_i32 = arith.constant 0 : i32
    %c0_i32_0 = arith.constant 0 : i32
    %c0_i32_1 = arith.constant 0 : i32
    return %c0_i32, %c0_i32_0 : i32, i32
  }
  func.func @transform_2(%arg0: i32) -> (i32, i32) {
    %c0_i32 = arith.constant 0 : i32
    %c0_i32_0 = arith.constant 0 : i32
    %c0_i32_1 = arith.constant 0 : i32
    return %c0_i32, %c0_i32_0 : i32, i32
  }
  func.func @transform_3(%arg0: i32) -> (i32, i32) {
    %c0_i32 = arith.constant 0 : i32
    %c0_i32_0 = arith.constant 0 : i32
    %c0_i32_1 = arith.constant 0 : i32
    return %c0_i32, %c0_i32_0 : i32, i32
  }
  func.func @transform_4(%arg0: i32) -> (i32, i32) {
    %c0_i32 = arith.constant 0 : i32
    %c0_i32_0 = arith.constant 0 : i32
    %c0_i32_1 = arith.constant 0 : i32
    return %c0_i32, %c0_i32_0 : i32, i32
  }
  func.func @transform_5(%arg0: i32) -> (i32, i32) {
    %c0_i32 = arith.constant 0 : i32
    %c0_i32_0 = arith.constant 0 : i32
    %c0_i32_1 = arith.constant 0 : i32
    return %c0_i32, %c0_i32_0 : i32, i32
  }
  func.func @transform_6(%arg0: i32) -> (i32, i32) {
    %c0_i32 = arith.constant 0 : i32
    %c0_i32_0 = arith.constant 0 : i32
    %c0_i32_1 = arith.constant 0 : i32
    return %c0_i32, %c0_i32_0 : i32, i32
  }
  func.func @transform_7(%arg0: i32) -> (i32, i32) {
    %c0_i32 = arith.constant 0 : i32
    %c0_i32_0 = arith.constant 0 : i32
    return %arg0, %c0_i32 : i32, i32
  }
}

module attributes {stable_mosaic.version = 11 : i64} {
  func.func @_mlp_fused_kernel(%arg0: i32, %arg1: memref<152x32xf32, #tpu.memory_space<vmem>>, %arg2: memref<32x128xf32, #tpu.memory_space<vmem>>, %arg3: memref<1x128xf32, #tpu.memory_space<vmem>>, %arg4: memref<128x128xf32, #tpu.memory_space<vmem>>, %arg5: memref<1x128xf32, #tpu.memory_space<vmem>>, %arg6: memref<128x128xf32, #tpu.memory_space<vmem>>, %arg7: memref<1x128xf32, #tpu.memory_space<vmem>>, %arg8: memref<152x128xf32, #tpu.memory_space<vmem>>) attributes {dimension_semantics = [#tpu.dimension_semantics<parallel>], iteration_bounds = array<i64: 2>, scalar_prefetch = 0 : i64, scratch_operands = 0 : i64, tpu.core_type = #tpu.core_type<tc>, window_params = [{transform_indices = @transform_0, window_bounds = array<i64: 152, 32>}, {pipeline_mode = #tpu.pipeline_mode<synchronous>, transform_indices = @transform_1, window_bounds = array<i64: 32, 128>}, {pipeline_mode = #tpu.pipeline_mode<synchronous>, transform_indices = @transform_2, window_bounds = array<i64: 1, 128>}, {pipeline_mode = #tpu.pipeline_mode<synchronous>, transform_indices = @transform_3, window_bounds = array<i64: 128, 128>}, {pipeline_mode = #tpu.pipeline_mode<synchronous>, transform_indices = @transform_4, window_bounds = array<i64: 1, 128>}, {pipeline_mode = #tpu.pipeline_mode<synchronous>, transform_indices = @transform_5, window_bounds = array<i64: 128, 128>}, {pipeline_mode = #tpu.pipeline_mode<synchronous>, transform_indices = @transform_6, window_bounds = array<i64: 1, 128>}, {transform_indices = @transform_7, window_bounds = array<i64: 152, 128>}]} {
    %c0 = arith.constant 0 : index
    %c0_0 = arith.constant 0 : index
    %0 = vector.load %arg1[%c0, %c0_0] : memref<152x32xf32, #tpu.memory_space<vmem>>, vector<152x32xf32>
    %c0_1 = arith.constant 0 : index
    %c0_2 = arith.constant 0 : index
    %1 = vector.load %arg2[%c0_1, %c0_2] : memref<32x128xf32, #tpu.memory_space<vmem>>, vector<32x128xf32>
    %cst = arith.constant dense<0.000000e+00> : vector<152x128xf32>
    %2 = tpu.matmul %0, %1, %cst {dimension_numbers = #tpu.dot_dimension_numbers<[1], [0], [0], [1], [0, 0, 1, 1], [], []>} : vector<152x32xf32>, vector<32x128xf32>, vector<152x128xf32> -> vector<152x128xf32>
    %c0_3 = arith.constant 0 : index
    %c0_4 = arith.constant 0 : index
    %3 = vector.load %arg3[%c0_3, %c0_4] : memref<1x128xf32, #tpu.memory_space<vmem>>, vector<1x128xf32>
    %4 = vector.broadcast %3 : vector<1x128xf32> to vector<152x128xf32>
    %5 = arith.addf %2, %4 : vector<152x128xf32>
    %cst_5 = arith.constant 5.000000e-01 : f32
    %6 = vector.broadcast %cst_5 : f32 to vector<152x128xf32>
    %7 = arith.mulf %6, %5 : vector<152x128xf32>
    %cst_6 = arith.constant 0.707106769 : f32
    %8 = vector.broadcast %cst_6 : f32 to vector<152x128xf32>
    %9 = arith.mulf %5, %8 : vector<152x128xf32>
    %10 = math.erf %9 : vector<152x128xf32>
    %cst_7 = arith.constant 1.000000e+00 : f32
    %11 = vector.broadcast %cst_7 : f32 to vector<152x128xf32>
    %12 = arith.addf %11, %10 : vector<152x128xf32>
    %13 = arith.mulf %7, %12 : vector<152x128xf32>
    %c0_8 = arith.constant 0 : index
    %c0_9 = arith.constant 0 : index
    %14 = vector.load %arg4[%c0_8, %c0_9] : memref<128x128xf32, #tpu.memory_space<vmem>>, vector<128x128xf32>
    %cst_10 = arith.constant dense<0.000000e+00> : vector<152x128xf32>
    %15 = tpu.matmul %13, %14, %cst_10 {dimension_numbers = #tpu.dot_dimension_numbers<[1], [0], [0], [1], [0, 0, 1, 1], [], []>} : vector<152x128xf32>, vector<128x128xf32>, vector<152x128xf32> -> vector<152x128xf32>
    %c0_11 = arith.constant 0 : index
    %c0_12 = arith.constant 0 : index
    %16 = vector.load %arg5[%c0_11, %c0_12] : memref<1x128xf32, #tpu.memory_space<vmem>>, vector<1x128xf32>
    %17 = vector.broadcast %16 : vector<1x128xf32> to vector<152x128xf32>
    %18 = arith.addf %15, %17 : vector<152x128xf32>
    %cst_13 = arith.constant 5.000000e-01 : f32
    %19 = vector.broadcast %cst_13 : f32 to vector<152x128xf32>
    %20 = arith.mulf %19, %18 : vector<152x128xf32>
    %cst_14 = arith.constant 0.707106769 : f32
    %21 = vector.broadcast %cst_14 : f32 to vector<152x128xf32>
    %22 = arith.mulf %18, %21 : vector<152x128xf32>
    %23 = math.erf %22 : vector<152x128xf32>
    %cst_15 = arith.constant 1.000000e+00 : f32
    %24 = vector.broadcast %cst_15 : f32 to vector<152x128xf32>
    %25 = arith.addf %24, %23 : vector<152x128xf32>
    %26 = arith.mulf %20, %25 : vector<152x128xf32>
    %c0_16 = arith.constant 0 : index
    %c0_17 = arith.constant 0 : index
    %27 = vector.load %arg6[%c0_16, %c0_17] : memref<128x128xf32, #tpu.memory_space<vmem>>, vector<128x128xf32>
    %cst_18 = arith.constant dense<0.000000e+00> : vector<152x128xf32>
    %28 = tpu.matmul %26, %27, %cst_18 {dimension_numbers = #tpu.dot_dimension_numbers<[1], [0], [0], [1], [0, 0, 1, 1], [], []>} : vector<152x128xf32>, vector<128x128xf32>, vector<152x128xf32> -> vector<152x128xf32>
    %c0_19 = arith.constant 0 : index
    %c0_20 = arith.constant 0 : index
    %29 = vector.load %arg7[%c0_19, %c0_20] : memref<1x128xf32, #tpu.memory_space<vmem>>, vector<1x128xf32>
    %30 = vector.broadcast %29 : vector<1x128xf32> to vector<152x128xf32>
    %31 = arith.addf %28, %30 : vector<152x128xf32>
    %c0_21 = arith.constant 0 : index
    %c0_22 = arith.constant 0 : index
    %32 = vector.load %arg8[%c0_21, %c0_22] : memref<152x128xf32, #tpu.memory_space<vmem>>, vector<152x128xf32>
    tpu.vector_store %arg8[%c0_21, %c0_22], %31 {strides = array<i32>} : memref<152x128xf32, #tpu.memory_space<vmem>>, vector<152x128xf32>,
    return
  }
  func.func @transform_0(%arg0: i32) -> (i32, i32) {
    %c0_i32 = arith.constant 0 : i32
    %c0_i32_0 = arith.constant 0 : i32
    return %arg0, %c0_i32 : i32, i32
  }
  func.func @transform_1(%arg0: i32) -> (i32, i32) {
    %c0_i32 = arith.constant 0 : i32
    %c0_i32_0 = arith.constant 0 : i32
    %c0_i32_1 = arith.constant 0 : i32
    return %c0_i32, %c0_i32_0 : i32, i32
  }
  func.func @transform_2(%arg0: i32) -> (i32, i32) {
    %c0_i32 = arith.constant 0 : i32
    %c0_i32_0 = arith.constant 0 : i32
    %c0_i32_1 = arith.constant 0 : i32
    return %c0_i32, %c0_i32_0 : i32, i32
  }
  func.func @transform_3(%arg0: i32) -> (i32, i32) {
    %c0_i32 = arith.constant 0 : i32
    %c0_i32_0 = arith.constant 0 : i32
    %c0_i32_1 = arith.constant 0 : i32
    return %c0_i32, %c0_i32_0 : i32, i32
  }
  func.func @transform_4(%arg0: i32) -> (i32, i32) {
    %c0_i32 = arith.constant 0 : i32
    %c0_i32_0 = arith.constant 0 : i32
    %c0_i32_1 = arith.constant 0 : i32
    return %c0_i32, %c0_i32_0 : i32, i32
  }
  func.func @transform_5(%arg0: i32) -> (i32, i32) {
    %c0_i32 = arith.constant 0 : i32
    %c0_i32_0 = arith.constant 0 : i32
    %c0_i32_1 = arith.constant 0 : i32
    return %c0_i32, %c0_i32_0 : i32, i32
  }
  func.func @transform_6(%arg0: i32) -> (i32, i32) {
    %c0_i32 = arith.constant 0 : i32
    %c0_i32_0 = arith.constant 0 : i32
    %c0_i32_1 = arith.constant 0 : i32
    return %c0_i32, %c0_i32_0 : i32, i32
  }
  func.func @transform_7(%arg0: i32) -> (i32, i32) {
    %c0_i32 = arith.constant 0 : i32
    %c0_i32_0 = arith.constant 0 : i32
    return %arg0, %c0_i32 : i32, i32
  }
}

</mosaic_0001>

<bundles_post_ra>
// kernel: tpu_custom_call.1
= control target key start
LH: loop header
LB: loop body
LE: loop exit
PB: predicated region body
PF: predicated region fallthrough
CT: control target
= control target key end

     0   :  { %12 = vsyncpa [#allocation3], 0  ;;  %s2347_s0 = inlined_call_operand.vmem [shape: f32[304,32], index: 0, kind: input, shape index: {}]   ;;  %s2348_s1 = inlined_call_operand.vmem [shape: f32[32,128], index: 1, kind: input, shape index: {}]   ;;  %s2349_s2 = inlined_call_operand.vmem [shape: f32[1,128], index: 2, kind: input, shape index: {}]   ;;  %s2350_s3 = inlined_call_operand.vmem [shape: f32[128,128], index: 3, kind: input, shape index: {}]   ;;  %s2351_s4 = inlined_call_operand.vmem [shape: f32[1,128], index: 4, kind: input, shape index: {}]   ;;  %s2352_s5 = inlined_call_operand.vmem [shape: f32[128,128], index: 5, kind: input, shape index: {}]   ;;  %s2353_s6 = inlined_call_operand.vmem [shape: f32[1,128], index: 6, kind: input, shape index: {}]   ;;  %s2354_s7 = inlined_call_operand.hbm [shape: f32[304,128], index: 7, kind: output, shape index: {}]  }
   0x1   :  { %14 = vsyncpa [#allocation3 + $0x1], 0  ;;  %s1835_s24 = smov 0   ;;  %s1837_s25 = smov 0  }
   0x2   :  { %s1839_s26 = smov 0   ;;  %s1841_s27 = smov 0  }
   0x3 LB: > { %s1856_s28 = sadd.s32 4294967295, %s1787_s27   ;;  %s1179_s29 = sadd.s32 4294967294, %s1787_s27   ;;  %s1787_s27 = sphi %s1841_s27, %s2360_s27   ;;  %s1783_s26 = sphi %s1839_s26, %s2359_s26   ;;  %s1779_s25 = sphi %s1837_s25, %s2358_s25   ;;  %s1775_s24 = sphi %s1835_s24, %s2357_s24  }
   0x4   : > { %s1860_s30 = sadd.s32 1, %s1787_s27   ;;  %s179_s8 = sadd.s32 1, %s1783_s26 }
   0x5   : > { %s176_s9 = ssub.s32 %s1787_s27, %s1860_s30  ;;  %p189_p0 = scmp.ne.s32.totalorder %s1783_s26, %s1779_s25 }
   0x6   : > { %p177_p1 = scmp.eq.s32.totalorder %s176_s9, 0  ;;  %p190_p2 = scmp.eq.s32.totalorder %s1856_s28, 1 }
   0x7   : > { %p195_p3 = scmp.ne.s32.totalorder %s1779_s25, %s1775_s24  ;;  %p196_p4 = scmp.eq.s32.totalorder %s1179_s29, 1 }
   0x8   : > { %s1871_s10 = scalar_select %p177_p1, %s1783_s26, %s179_s8  }
   0x9   : > { %p1873_p5 = por %p190_p2, %p189_p0  ;;  %p1877_p6 = por %p196_p4, %p195_p3 }
   0xa   : > { %p1182_p7 = scmp.ge.s32.totalorder %s1787_s27, 1  ;;  %p241_p8 = scmp.lt.s32.totalorder %s1787_s27, 3 }
   0xc   : > { %p242_p9 = pnand %p1182_p7, %p241_p8 }
   0xd   : > { %v299_v0 = vld [vmem:[%s2348_s1] sm:$0xff] (!%p242_p9)  ;;  %v300_v1 = vld [vmem:[%s2348_s1 + $0x8] sm:$0xff] (!%p242_p9)  ;;  %v301_v2 = vld [vmem:[%s2348_s1 + $0x10] sm:$0xff] (!%p242_p9)  ;;  %v1789_v3 = vmov (!%p242_p9), 0.0|0.0   ;;  %vm1790_vm0 = vmmov (!%p242_p9), 0   ;;  %v1791_v6 = vmov (!%p242_p9), 0.0  }
   0xe   : > { %245 = sbr.rel (%p242_p9) target bundleno = 788 (0x314), region = 48  ;;  %1546 = vmatprep.subr.bf16.mxu0 (!%p242_p9), %v1789_v3  ;;  %v1547_v4 = vpack.c.bf16 (!%p242_p9), %v300_v1, %v299_v0  ;;  %v302_v5 = vld [vmem:[%s2348_s1 + $0x18] sm:$0xff] (!%p242_p9)  ;;  %1311 = vmatprep.mubr.msk.f32.mxu0 (!%p242_p9), %vm1790_vm0, %v1791_v6  ;;  %v623_v8 = vld [vmem:[%s2350_s3] sm:$0xff] (!%p242_p9)  ;;  %v624_v9 = vld [vmem:[%s2350_s3 + $0x8] sm:$0xff] (!%p242_p9)  ;;  %vm310_vm1 = vcmask (!%p242_p9), 261120   ;;  %s270_s29 = sand.u32 (!%p242_p9), 1, %s1779_s25  }
   0xf   : > { %s273_s21 = smul.u32 (!%p242_p9), 19, %s1856_s28  ;;  %1600 = vmatprep.subr.bf16.mxu1 (!%p242_p9), %v1789_v3  ;;  %1341 = vmatprep.mubr.msk.f32.mxu1 (!%p242_p9), %vm1790_vm0, %v1791_v6  ;;  %v1550_v7 = vpack.c.bf16 (!%p242_p9), %v302_v5, %v301_v2  ;;  %v1553_v11 = vpack.c.bf16 (!%p242_p9), %v624_v9, %v623_v8  ;;  %v625_v12 = vld [vmem:[%s2350_s3 + $0x10] sm:$0xff] (!%p242_p9)  ;;  %v626_v13 = vld [vmem:[%s2350_s3 + $0x18] sm:$0xff] (!%p242_p9)  ;;  %v627_v18 = vld [vmem:[%s2350_s3 + $0x20] sm:$0xff] (!%p242_p9) }
  0x10   : > { %1548 = vmatpush3.bf16.msra.mxu0 (!%p242_p9), %v1547_v4  ;;  %1602 = vmatpush3.bf16.msra.mxu1 (!%p242_p9), %v1547_v4  ;;  %v1556_v17 = vpack.c.bf16 (!%p242_p9), %v626_v13, %v625_v12  ;;  %v628_v19 = vld [vmem:[%s2350_s3 + $0x28] sm:$0xff] (!%p242_p9)  ;;  %v629_v23 = vld [vmem:[%s2350_s3 + $0x30] sm:$0xff] (!%p242_p9)  ;;  %v630_v24 = vld [vmem:[%s2350_s3 + $0x38] sm:$0xff] (!%p242_p9)  ;;  %s1604_s8 = smul.u32 (!%p242_p9), 152, %s270_s29 }
  0x11   : > { %p274_p10 = scmp.lt.s32.totalorder (!%p242_p9), %s273_s21, 37  ;;  %1549 = vmatprep.subr.bf16.mxu0 (!%p242_p9), %v1789_v3  ;;  %1601 = vmatprep.subr.bf16.mxu1 (!%p242_p9), %v1789_v3  ;;  %v1559_v22 = vpack.c.bf16 (!%p242_p9), %v628_v19, %v627_v18  ;;  %v1562_v27 = vpack.c.bf16 (!%p242_p9), %v630_v24, %v629_v23  ;;  %v631_v39 = vld [vmem:[%s2350_s3 + $0x40] sm:$0xff] (!%p242_p9)  ;;  %v632_v40 = vld [vmem:[%s2350_s3 + $0x48] sm:$0xff] (!%p242_p9)  ;;  %v633_v42 = vld [vmem:[%s2350_s3 + $0x50] sm:$0xff] (!%p242_p9)  ;;  %s1209_s16 = smul.u32 (!%p242_p9), 2432, %s1856_s28 }
  0x12   : > { %v1565_v41 = vpack.c.bf16 (!%p242_p9), %v632_v40, %v631_v39  ;;  %v634_v43 = vld [vmem:[%s2350_s3 + $0x58] sm:$0xff] (!%p242_p9)  ;;  %v635_v45 = vld [vmem:[%s2350_s3 + $0x60] sm:$0xff] (!%p242_p9)  ;;  %v636_v46 = vld [vmem:[%s2350_s3 + $0x68] sm:$0xff] (!%p242_p9)  ;;  %s2256_s14 = scalar_lea.vmem (!%p242_p9), [#allocation2], %s1604_s8  ;;  %s2306_s28 = scalar_lea.sflag (!%p242_p9), [#allocation3], %s270_s29 }
  0x13   : > { %v1568_v44 = vpack.c.bf16 (!%p242_p9), %v634_v43, %v633_v42  ;;  %v1571_v47 = vpack.c.bf16 (!%p242_p9), %v636_v46, %v635_v45  ;;  %v637_v48 = vld [vmem:[%s2350_s3 + $0x70] sm:$0xff] (!%p242_p9)  ;;  %v638_v49 = vld [vmem:[%s2350_s3 + $0x78] sm:$0xff] (!%p242_p9)  ;;  %v901_v51 = vld [vmem:[%s2352_s5] sm:$0xff] (!%p242_p9)  ;;  %s1117_s17 = sshll.u32 (!%p242_p9), %s2256_s14, 4  ;;  %s2298_s19 = scalar_lea.hbm (!%p242_p9), %s2354_s7, %s1209_s16  ;;  %s2300_s17 = int_to_ptr.vmem [resolvable:$true] %s1117_s17 }
  0x14   : > { %1551 = vmatpush3.bf16.msra.mxu0 (!%p242_p9), %v1550_v7  ;;  %1603 = vmatpush3.bf16.msra.mxu1 (!%p242_p9), %v1550_v7  ;;  %v1574_v50 = vpack.c.bf16 (!%p242_p9), %v638_v49, %v637_v48  ;;  %v902_v52 = vld [vmem:[%s2352_s5 + $0x8] sm:$0xff] (!%p242_p9)  ;;  %v903_v53 = vld [vmem:[%s2352_s5 + $0x10] sm:$0xff] (!%p242_p9)  ;;  %v904_v55 = vld [vmem:[%s2352_s5 + $0x18] sm:$0xff] (!%p242_p9)  ;;  %s1725_s20 = scalar_lea.vmem (!%p242_p9), %s2300_s17, 2432 }
  0x15   : > { %s2362_s21 = smov (!%p274_p10, %s273_s21), 37  ;;  %1552 = vmatprep.subr.bf16.mxu1 %v1789_v3  ;;  %1576 = vmatprep.subr.bf16.mxu0 %v1789_v3  ;;  %v1577_v54 = vpack.c.bf16 %v902_v52, %v901_v51  ;;  %v1580_v56 = vpack.c.bf16 %v904_v55, %v903_v53  ;;  %v905_v57 = vld [vmem:[%s2352_s5 + $0x20] sm:$0xff]  ;;  %v906_v58 = vld [vmem:[%s2352_s5 + $0x28] sm:$0xff]  ;;  %v907_v60 = vld [vmem:[%s2352_s5 + $0x30] sm:$0xff]  ;;  %p1726_p11 = scmp.ne.s32.totalorder %s2300_s17, %s1725_s20 }
  0x16   : > { %s1183_s9 = sshll.u32 %s2362_s21, 3  ;;  %v1583_v59 = vpack.c.bf16 %v906_v58, %v905_v57  ;;  %v908_v61 = vld [vmem:[%s2352_s5 + $0x38] sm:$0xff]  ;;  %v2073_v63 = vld [vmem:[%s2349_s2] ss:$0 sm:$0xff]  ;;  %s1792_s21 = smov [#allocation2]  }
  0x17   : > { %s1913_s15 = scalar_lea.vmem %s2347_s0, %s1183_s9  ;;  %v1586_v62 = vpack.c.bf16 %v908_v61, %v907_v60  ;;  %p1727_p12 = pnand %p1726_p11, %p1873_p5 }
  0x18   : > { %v280_v10 = vld [vmem:[%s1913_s15] sm:$0xff]  ;;  %v281_v14 = vld [vmem:[%s1913_s15 + $0x8] sm:$0xff]  ;;  %v290_v15 = vld [vmem:[%s1913_s15 + $0x50] sm:$0xff]  ;;  %s1729_s22 = sshll.u32 %s1792_s21, 4  ;;  %s1730_s22 = int_to_ptr.vmem [resolvable:$false] %s1729_s22 }
  0x19   : > { %1312 = vmatmul.mubr.msk.f32.vlgmr.msra.gmra.mrb[0].mxu0 %vm310_vm1, %v280_v10  ;;  %1342 = vmatmul.mubr.msk.f32.vlgmr.msra.gmra.mrb[0].mxu1 %vm310_vm1, %v290_v15  ;;  %v291_v16 = vld [vmem:[%s1913_s15 + $0x58] sm:$0xff]  ;;  %v282_v20 = vld [vmem:[%s1913_s15 + $0x10] sm:$0xff]  ;;  %v292_v21 = vld [vmem:[%s1913_s15 + $0x60] sm:$0xff]  ;;  %p1728_p13 = pneg %p1727_p12  ;;  %s1731_s23 = scalar_lea.vmem %s1730_s22, 4864 }
  0x1a   : > { %1314 = vmatprep.mubr.msk.f32.mxu0 %vm1790_vm0, %v1791_v6  ;;  %1344 = vmatprep.mubr.msk.f32.mxu1 %vm1790_vm0, %v1791_v6  ;;  %v283_v25 = vld [vmem:[%s1913_s15 + $0x18] sm:$0xff]  ;;  %v293_v26 = vld [vmem:[%s1913_s15 + $0x68] sm:$0xff]  ;;  %v284_v28 = vld [vmem:[%s1913_s15 + $0x20] sm:$0xff]  ;;  %p1732_p0 = scmp.lt.s32.totalorder %s2300_s17, %s1730_s22  ;;  %p1733_p1 = scmp.lt.s32.totalorder %s1731_s23, %s1725_s20 }
  0x1b   : > { %1554 = vmatpush3.bf16.msra.mxu1 %v1553_v11  ;;  %v294_v29 = vld [vmem:[%s1913_s15 + $0x70] sm:$0xff]  ;;  %v285_v30 = vld [vmem:[%s1913_s15 + $0x28] sm:$0xff]  ;;  %v295_v31 = vld [vmem:[%s1913_s15 + $0x78] sm:$0xff]  ;;  %1578 = vmatpush3.bf16.msra.mxu0 %v1577_v54 }
  0x1c   : > { %1555 = vmatprep.subr.bf16.mxu1 %v1789_v3  ;;  %v286_v32 = vld [vmem:[%s1913_s15 + $0x30] sm:$0xff]  ;;  %v296_v33 = vld [vmem:[%s1913_s15 + $0x80] sm:$0xff]  ;;  %v287_v34 = vld [vmem:[%s1913_s15 + $0x38] sm:$0xff]  ;;  %1579 = vmatprep.subr.bf16.mxu0 %v1789_v3  ;;  %p1734_p2 = por %p1733_p1, %p1732_p0 }
  0x1d   : > { %1315 = vmatmul.mubr.msk.f32.gmra.mrb[2].mxu0 %vm310_vm1, %v281_v14  ;;  %1345 = vmatmul.mubr.msk.f32.gmra.mrb[2].mxu1 %vm310_vm1, %v291_v16  ;;  %v297_v35 = vld [vmem:[%s1913_s15 + $0x88] sm:$0xff]  ;;  %v288_v36 = vld [vmem:[%s1913_s15 + $0x40] sm:$0xff]  ;;  %v298_v37 = vld [vmem:[%s1913_s15 + $0x90] sm:$0xff] }
  0x1e   : > { %1317 = vmatprep.mubr.msk.f32.mxu0 %vm1790_vm0, %v1791_v6  ;;  %1347 = vmatprep.mubr.msk.f32.mxu1 %vm1790_vm0, %v1791_v6  ;;  %v289_v38 = vld [vmem:[%s1913_s15 + $0x48] sm:$0xff]  ;;  %p1735_p3 = pnand %p1734_p2, %p1728_p13 }
  0x1f   : > { %1557 = vmatpush3.bf16.msra.mxu1 %v1556_v17  ;;  %1581 = vmatpush3.bf16.msra.mxu0 %v1580_v56 }
  0x20   : > { %1558 = vmatprep.subr.bf16.mxu1 %v1789_v3  ;;  %1582 = vmatprep.subr.bf16.mxu0 %v1789_v3 }
  0x21   : > { %1318 = vmatmul.mubr.msk.f32.gmra.mrb[4].mxu0 %vm310_vm1, %v282_v20  ;;  %1348 = vmatmul.mubr.msk.f32.gmra.mrb[4].mxu1 %vm310_vm1, %v292_v21 }
  0x22   : > { %1320 = vmatprep.mubr.msk.f32.mxu0 %vm1790_vm0, %v1791_v6  ;;  %1350 = vmatprep.mubr.msk.f32.mxu1 %vm1790_vm0, %v1791_v6 }
  0x23   : > { %1560 = vmatpush3.bf16.msra.mxu1 %v1559_v22  ;;  %1584 = vmatpush3.bf16.msra.mxu0 %v1583_v59 }
  0x24   : > { %1561 = vmatprep.subr.bf16.mxu1 %v1789_v3  ;;  %1585 = vmatprep.subr.bf16.mxu0 %v1789_v3 }
  0x25   : > { %1321 = vmatmul.mubr.msk.f32.gmra.mrb[6].mxu0 %vm310_vm1, %v283_v25  ;;  %1351 = vmatmul.mubr.msk.f32.gmra.mrb[6].mxu1 %vm310_vm1, %v293_v26 }
  0x26   : > { %1323 = vmatprep.mubr.msk.f32.mxu0 %vm1790_vm0, %v1791_v6  ;;  %1353 = vmatprep.mubr.msk.f32.mxu1 %vm1790_vm0, %v1791_v6 }
  0x27   : > { %1563 = vmatpush3.bf16.msra.mxu1 %v1562_v27  ;;  %1587 = vmatpush3.bf16.msra.mxu0 %v1586_v62 }
  0x28   : > { %1564 = vmatprep.subr.bf16.mxu1 %v1789_v3  ;;  %1588 = vmatprep.subr.bf16.mxu0 %v1789_v3 }
  0x29   : > { %1324 = vmatmul.mubr.msk.f32.gmra.mrb[8].mxu0 %vm310_vm1, %v284_v28  ;;  %1354 = vmatmul.mubr.msk.f32.gmra.mrb[8].mxu1 %vm310_vm1, %v294_v29 }
  0x2a   : > { %1326 = vmatprep.mubr.msk.f32.mxu0 %vm1790_vm0, %v1791_v6  ;;  %1356 = vmatprep.mubr.msk.f32.mxu1 %vm1790_vm0, %v1791_v6 }
  0x2b   : > { %1566 = vmatpush3.bf16.msra.mxu1 %v1565_v41 }
  0x2c   : > { %1567 = vmatprep.subr.bf16.mxu1 %v1789_v3 }
  0x2d   : > { %1327 = vmatmul.mubr.msk.f32.gmra.mrb[10].mxu0 %vm310_vm1, %v285_v30  ;;  %1357 = vmatmul.mubr.msk.f32.gmra.mrb[10].mxu1 %vm310_vm1, %v295_v31 }
  0x2e   : > { %1329 = vmatprep.mubr.msk.f32.mxu0 %vm1790_vm0, %v1791_v6  ;;  %1359 = vmatprep.mubr.msk.f32.mxu1 %vm1790_vm0, %v1791_v6 }
  0x2f   : > { %1569 = vmatpush3.bf16.msra.mxu1 %v1568_v44 }
  0x30   : > { %1570 = vmatprep.subr.bf16.mxu1 %v1789_v3 }
  0x31   : > { %1330 = vmatmul.mubr.msk.f32.gmra.mrb[12].mxu0 %vm310_vm1, %v286_v32  ;;  %1360 = vmatmul.mubr.msk.f32.gmra.mrb[12].mxu1 %vm310_vm1, %v296_v33 }
  0x32   : > { %1332 = vmatprep.mubr.msk.f32.mxu0 %vm1790_vm0, %v1791_v6  ;;  %1362 = vmatprep.mubr.msk.f32.mxu1 %vm1790_vm0, %v1791_v6 }
  0x33   : > { %1572 = vmatpush3.bf16.msra.mxu1 %v1571_v47 }
  0x34   : > { %1573 = vmatprep.subr.bf16.mxu1 %v1789_v3 }
  0x35   : > { %1333 = vmatmul.mubr.msk.f32.gmra.mrb[14].mxu0 %vm310_vm1, %v287_v34  ;;  %1363 = vmatmul.mubr.msk.f32.gmra.mrb[14].mxu1 %vm310_vm1, %v297_v35 }
  0x36   : > { %1335 = vmatprep.mubr.msk.f32.mxu0 %vm1790_vm0, %v1791_v6  ;;  %1365 = vmatprep.mubr.msk.f32.mxu1 %vm1790_vm0, %v1791_v6 }
  0x37   : > { %1575 = vmatpush3.bf16.msra.mxu1 %v1574_v50 }
  0x39   : > { %1336 = vmatmul.mubr.msk.f32.gmra.mrb[16].mxu0 %vm310_vm1, %v288_v36  ;;  %1366 = vmatmul.mubr.msk.f32.gmra.mrb[16].mxu1 %vm310_vm1, %v298_v37 }
  0x3a   : > { %1338 = vmatprep.mubr.msk.f32.mxu0 %vm1790_vm0, %v1791_v6  ;;  %1400 = vmatprep.mubr.msk.f32.mxu1 %vm1790_vm0, %v1791_v6 }
  0x3d   : > { %1339 = vmatmul.mubr.msk.f32.gmra.mrb[18].mxu0 %vm310_vm1, %v289_v38 }
  0x3e   : > { %1489 = vmatprep.mubr.msk.f32.mxu0 %vm1790_vm0, %v1791_v6 }
  0xec   : > { %v434_v0 = vpop.f32.mrb[0].mxu0  ;;  %v2076_v4 = vpop.f32.mrb[0].mxu1 }
  0xed   : > { %v435_v1 = vadd.f32 %v2073_v63, %v434_v0  ;;  %v1313_v2 = vpop.f32.mrb[1].mxu0  ;;  %v1343_v7 = vpop.f32.mrb[1].mxu1 }
  0xef   : > { %v547_v5 = vmul.f32 0.70710677, %v435_v1  ;;  %v528_v27 = vmul.f32 0.5, %v435_v1 }
  0xf0   : > { %v439_v8 = vpop.f32.mrb[2].mxu0  ;;  %v2079_v11 = vpop.f32.mrb[2].mxu1 }
  0xf1   : > { %1649 = verf.f32 %v547_v5  ;;  %v440_v9 = vadd.f32 %v2073_v63, %v439_v8  ;;  %v1316_v10 = vpop.f32.mrb[3].mxu0  ;;  %v1346_v13 = vpop.f32.mrb[3].mxu1 }
  0xf3   : > { %v548_v12 = vmul.f32 0.70710677, %v440_v9  ;;  %v529_v37 = vmul.f32 0.5, %v440_v9 }
  0xf4   : > { %v444_v14 = vpop.f32.mrb[4].mxu0  ;;  %v2082_v17 = vpop.f32.mrb[4].mxu1 }
  0xf5   : > { %1651 = verf.f32 %v548_v12  ;;  %v445_v15 = vadd.f32 %v2073_v63, %v444_v14  ;;  %v1319_v16 = vpop.f32.mrb[5].mxu0  ;;  %v1349_v19 = vpop.f32.mrb[5].mxu1  ;;  %v485_v12 = vadd.f32 %v2073_v63, %v2076_v4 }
  0xf7   : > { %v549_v18 = vmul.f32 0.70710677, %v445_v15  ;;  %v530_v47 = vmul.f32 0.5, %v445_v15  ;;  %v557_v4 = vmul.f32 0.70710677, %v485_v12 }
  0xf8   : > { %v449_v20 = vpop.f32.mrb[6].mxu0  ;;  %v2085_v23 = vpop.f32.mrb[6].mxu1 }
  0xf9   : > { %1653 = verf.f32 %v549_v18  ;;  %v450_v21 = vadd.f32 %v2073_v63, %v449_v20  ;;  %v1322_v22 = vpop.f32.mrb[7].mxu0  ;;  %v1352_v26 = vpop.f32.mrb[7].mxu1 }
  0xfb   : > { %v1650_v24 = vpop.eup %1649  ;;  %v550_v25 = vmul.f32 0.70710677, %v450_v21  ;;  %v531_v58 = vmul.f32 0.5, %v450_v21 }
  0xfc   : > { %v585_v28 = vadd.f32 1.0, %v1650_v24  ;;  %v454_v29 = vpop.f32.mrb[8].mxu0  ;;  %v2088_v33 = vpop.f32.mrb[8].mxu1 }
  0xfd   : > { %1655 = verf.f32 %v550_v25  ;;  %v455_v30 = vadd.f32 %v2073_v63, %v454_v29  ;;  %v1325_v31 = vpop.f32.mrb[9].mxu0  ;;  %v1355_v36 = vpop.f32.mrb[9].mxu1 }
  0xfe   : > { %v604_v32 = vmul.f32 %v585_v28, %v528_v27  ;;  %v490_v27 = vadd.f32 %v2073_v63, %v2079_v11 }
  0xff   : > { %v1652_v34 = vpop.eup %1651  ;;  %v551_v35 = vmul.f32 0.70710677, %v455_v30  ;;  %v532_v9 = vmul.f32 0.5, %v455_v30 }
 0x100   : > { %v586_v38 = vadd.f32 1.0, %v1652_v34  ;;  %v459_v39 = vpop.f32.mrb[10].mxu0  ;;  %1401 = vmatmul.mubr.f32.vlgmr.msra.gmra.mrb[18].mxu1 %v604_v32  ;;  %v2093_v43 = vpop.f32.mrb[10].mxu1  ;;  %v558_v36 = vmul.f32 0.70710677, %v490_v27 }
 0x101   : > { %1657 = verf.f32 %v551_v35  ;;  %v460_v40 = vadd.f32 %v2073_v63, %v459_v39  ;;  %v1328_v41 = vpop.f32.mrb[11].mxu0  ;;  %1403 = vmatprep.mubr.msk.f32.mxu1 %vm1790_vm0, %v1791_v6  ;;  %v1358_v46 = vpop.f32.mrb[11].mxu1 }
 0x102   : > { %v605_v42 = vmul.f32 %v586_v38, %v529_v37  ;;  %v495_v37 = vadd.f32 %v2073_v63, %v2082_v17 }
 0x103   : > { %v1654_v44 = vpop.eup %1653  ;;  %v552_v45 = vmul.f32 0.70710677, %v460_v40  ;;  %v533_v24 = vmul.f32 0.5, %v460_v40 }
 0x104   : > { %v587_v48 = vadd.f32 1.0, %v1654_v44  ;;  %v464_v49 = vpop.f32.mrb[12].mxu0  ;;  %1404 = vmatmul.mubr.f32.gmra.mrb[20].mxu1 %v605_v42  ;;  %v514_v53 = vpop.f32.mrb[12].mxu1  ;;  %v559_v41 = vmul.f32 0.70710677, %v495_v37  ;;  %v500_v42 = vadd.f32 %v2073_v63, %v2085_v23 }
 0x105   : > { %1659 = verf.f32 %v552_v45  ;;  %v465_v50 = vadd.f32 %v2073_v63, %v464_v49  ;;  %v1331_v51 = vpop.f32.mrb[13].mxu0  ;;  %1406 = vmatprep.mubr.msk.f32.mxu1 %vm1790_vm0, %v1791_v6  ;;  %v2099_v56 = vadd.f32 %v2073_v63, %v514_v53  ;;  %v1361_v57 = vpop.f32.mrb[13].mxu1 }
 0x106   : > { %v606_v52 = vmul.f32 %v587_v48, %v530_v47  ;;  %v560_v47 = vmul.f32 0.70710677, %v500_v42  ;;  %v505_v48 = vadd.f32 %v2073_v63, %v2088_v33 }
 0x107   : > { %v1656_v54 = vpop.eup %1655  ;;  %v553_v55 = vmul.f32 0.70710677, %v465_v50  ;;  %v534_v34 = vmul.f32 0.5, %v465_v50 }
 0x108   : > { %v588_v59 = vadd.f32 1.0, %v1656_v54  ;;  %v469_v60 = vpop.f32.mrb[14].mxu0  ;;  %1407 = vmatmul.mubr.f32.gmra.mrb[22].mxu1 %v606_v52  ;;  %v519_v1 = vpop.f32.mrb[14].mxu1  ;;  %v561_v53 = vmul.f32 0.70710677, %v505_v48  ;;  %v510_v54 = vadd.f32 %v2073_v63, %v2093_v43  ;;  %v540_v43 = vmul.f32 0.5, %v495_v37 }
 0x109   : > { %1661 = verf.f32 %v553_v55  ;;  %v470_v61 = vadd.f32 %v2073_v63, %v469_v60  ;;  %v1334_v62 = vpop.f32.mrb[15].mxu0  ;;  %1409 = vmatprep.mubr.msk.f32.mxu1 %vm1790_vm0, %v1791_v6  ;;  %v2105_v7 = vadd.f32 %v2073_v63, %v519_v1  ;;  %v1364_v8 = vpop.f32.mrb[15].mxu1  ;;  %v538_v55 = vmul.f32 0.5, %v485_v12  ;;  %v910_v37 = vld [vmem:[%s2352_s5 + $0x48] sm:$0xff] }
 0x10a   : > { %v607_v0 = vmul.f32 %v588_v59, %v531_v58  ;;  %v562_v59 = vmul.f32 0.70710677, %v510_v54  ;;  %v539_v60 = vmul.f32 0.5, %v490_v27 }
 0x10b   : > { %v1658_v2 = vpop.eup %1657  ;;  %v554_v5 = vmul.f32 0.70710677, %v470_v61  ;;  %v535_v39 = vmul.f32 0.5, %v470_v61  ;;  %v564_v8 = vmul.f32 0.70710677, %v2105_v7 }
 0x10c   : > { %v589_v10 = vadd.f32 1.0, %v1658_v2  ;;  %v474_v13 = vpop.f32.mrb[16].mxu0  ;;  %1410 = vmatmul.mubr.f32.gmra.mrb[24].mxu1 %v607_v0  ;;  %v524_v18 = vpop.f32.mrb[16].mxu1 }
 0x10d   : > { %1663 = verf.f32 %v554_v5  ;;  %v475_v14 = vadd.f32 %v2073_v63, %v474_v13  ;;  %v1337_v15 = vpop.f32.mrb[17].mxu0  ;;  %1412 = vmatprep.mubr.msk.f32.mxu1 %vm1790_vm0, %v1791_v6  ;;  %v2113_v21 = vadd.f32 %v2073_v63, %v524_v18  ;;  %v1367_v22 = vpop.f32.mrb[17].mxu1 }
 0x10e   : > { %v608_v16 = vmul.f32 %v589_v10, %v532_v9  ;;  %v541_v9 = vmul.f32 0.5, %v500_v42  ;;  %v542_v15 = vmul.f32 0.5, %v505_v48 }
 0x10f   : > { %v1660_v19 = vpop.eup %1659  ;;  %v555_v20 = vmul.f32 0.70710677, %v475_v14  ;;  %v536_v17 = vmul.f32 0.5, %v475_v14  ;;  %v565_v14 = vmul.f32 0.70710677, %v2113_v21 }
 0x110   : > { %v590_v25 = vadd.f32 1.0, %v1660_v19  ;;  %v479_v26 = vpop.f32.mrb[18].mxu0  ;;  %1413 = vmatmul.mubr.f32.gmra.mrb[26].mxu1 %v608_v16 }
 0x111   : > { %1665 = verf.f32 %v555_v20  ;;  %v480_v28 = vadd.f32 %v2073_v63, %v479_v26  ;;  %v1340_v29 = vpop.f32.mrb[19].mxu0  ;;  %1415 = vmatprep.mubr.msk.f32.mxu1 %vm1790_vm0, %v1791_v6  ;;  %v563_v63 = vmul.f32 0.70710677, %v2099_v56  ;;  %v543_v20 = vmul.f32 0.5, %v510_v54 }
 0x112   : > { %v609_v30 = vmul.f32 %v590_v25, %v533_v24  ;;  %1667 = verf.f32 %v557_v4  ;;  %v544_v4 = vmul.f32 0.5, %v2099_v56  ;;  %v545_v29 = vmul.f32 0.5, %v2105_v7  ;;  %v909_v7 = vld [vmem:[%s2352_s5 + $0x40] sm:$0xff] }
 0x113   : > { %v1662_v31 = vpop.eup %1661  ;;  %v556_v32 = vmul.f32 0.70710677, %v480_v28  ;;  %v537_v23 = vmul.f32 0.5, %v480_v28 }
 0x114   : > { %v591_v35 = vadd.f32 1.0, %v1662_v31  ;;  %1416 = vmatmul.mubr.f32.gmra.mrb[28].mxu1 %v609_v30 }
 0x115   : > { %1669 = verf.f32 %v556_v32  ;;  %1418 = vmatprep.mubr.msk.f32.mxu1 %vm1790_vm0, %v1791_v6 }
 0x116   : > { %v610_v11 = vmul.f32 %v591_v35, %v534_v34  ;;  %1671 = verf.f32 %v558_v36  ;;  %v546_v34 = vmul.f32 0.5, %v2113_v21  ;;  %v911_v21 = vld [vmem:[%s2352_s5 + $0x50] sm:$0xff] }
 0x117   : > { %v1664_v38 = vpop.eup %1663  ;;  %1673 = verf.f32 %v559_v41  ;;  %v914_v41 = vld [vmem:[%s2352_s5 + $0x68] sm:$0xff] }
 0x118   : > { %v592_v40 = vadd.f32 1.0, %v1664_v38  ;;  %1419 = vmatmul.mubr.f32.gmra.mrb[30].mxu1 %v610_v11  ;;  %1675 = verf.f32 %v560_v47  ;;  %v1589_v11 = vpack.c.bf16 %v910_v37, %v909_v7  ;;  %v912_v38 = vld [vmem:[%s2352_s5 + $0x58] sm:$0xff] }
 0x119   : > { %1421 = vmatprep.mubr.msk.f32.mxu1 %vm1790_vm0, %v1791_v6  ;;  %1677 = verf.f32 %v561_v53 }
 0x11a   : > { %v611_v44 = vmul.f32 %v592_v40, %v535_v39  ;;  %1679 = verf.f32 %v562_v59  ;;  %1590 = vmatpush3.bf16.msra.mxu0 %v1589_v11  ;;  %v1592_v39 = vpack.c.bf16 %v912_v38, %v911_v21  ;;  %v913_v40 = vld [vmem:[%s2352_s5 + $0x60] sm:$0xff] }
 0x11b   : > { %v1666_v45 = vpop.eup %1665  ;;  %1681 = verf.f32 %v563_v63  ;;  %1591 = vmatprep.subr.bf16.mxu0 %v1789_v3  ;;  %v1595_v42 = vpack.c.bf16 %v914_v41, %v913_v40 }
 0x11c   : > { %v593_v46 = vadd.f32 1.0, %v1666_v45  ;;  %1422 = vmatmul.mubr.f32.gmra.mrb[32].mxu1 %v611_v44  ;;  %v1668_v49 = vpop.eup %1667  ;;  %1683 = verf.f32 %v564_v8  ;;  %v915_v44 = vld [vmem:[%s2352_s5 + $0x70] sm:$0xff]  ;;  %v916_v45 = vld [vmem:[%s2352_s5 + $0x78] sm:$0xff] }
 0x11d   : > { %1424 = vmatprep.mubr.msk.f32.mxu1 %vm1790_vm0, %v1791_v6  ;;  %v595_v57 = vadd.f32 1.0, %v1668_v49  ;;  %1685 = verf.f32 %v565_v14 }
 0x11e   : > { %v612_v50 = vmul.f32 %v593_v46, %v536_v17  ;;  %1593 = vmatpush3.bf16.msra.mxu0 %v1592_v39  ;;  %v1598_v17 = vpack.c.bf16 %v916_v45, %v915_v44  ;;  %v2190_v46 = vld [vmem:[%s2351_s4] ss:$0 sm:$0xff] }
 0x11f   : > { %v1670_v51 = vpop.eup %1669  ;;  %v614_v62 = vmul.f32 %v595_v57, %v538_v55  ;;  %1594 = vmatprep.subr.bf16.mxu0 %v1789_v3 }
 0x120   : > { %v594_v52 = vadd.f32 1.0, %v1670_v51  ;;  %1425 = vmatmul.mubr.f32.gmra.mrb[34].mxu1 %v612_v50  ;;  %v1672_v58 = vpop.eup %1671 }
 0x121   : > { %1427 = vmatprep.mubr.msk.f32.mxu1 %vm1790_vm0, %v1791_v6  ;;  %v596_v61 = vadd.f32 1.0, %v1672_v58  ;;  %v1674_v0 = vpop.eup %1673 }
 0x122   : > { %v613_v33 = vmul.f32 %v594_v52, %v537_v23  ;;  %v597_v1 = vadd.f32 1.0, %v1674_v0  ;;  %v1676_v5 = vpop.eup %1675  ;;  %1596 = vmatpush3.bf16.msra.mxu0 %v1595_v42 }
 0x123   : > { %v615_v2 = vmul.f32 %v596_v61, %v539_v60  ;;  %v598_v10 = vadd.f32 1.0, %v1676_v5  ;;  %v1678_v13 = vpop.eup %1677  ;;  %1597 = vmatprep.subr.bf16.mxu0 %v1789_v3 }
 0x124   : > { %1428 = vmatmul.mubr.f32.gmra.mrb[36].mxu1 %v613_v33  ;;  %v616_v12 = vmul.f32 %v597_v1, %v540_v43  ;;  %v599_v16 = vadd.f32 1.0, %v1678_v13  ;;  %v1680_v19 = vpop.eup %1679 }
 0x125   : > { %1430 = vmatprep.mubr.msk.f32.mxu1 %vm1790_vm0, %v1791_v6  ;;  %v617_v18 = vmul.f32 %v598_v10, %v541_v9  ;;  %v600_v22 = vadd.f32 1.0, %v1680_v19  ;;  %v1682_v25 = vpop.eup %1681 }
 0x126   : > { %v618_v24 = vmul.f32 %v599_v16, %v542_v15  ;;  %v601_v26 = vadd.f32 1.0, %v1682_v25  ;;  %v1684_v28 = vpop.eup %1683  ;;  %1599 = vmatpush3.bf16.msra.mxu0 %v1598_v17 }
 0x127   : > { %v619_v27 = vmul.f32 %v600_v22, %v543_v20  ;;  %v602_v30 = vadd.f32 1.0, %v1684_v28  ;;  %v1686_v32 = vpop.eup %1685 }
 0x128   : > { %1431 = vmatmul.mubr.f32.gmra.mrb[38].mxu1 %v614_v62  ;;  %v620_v31 = vmul.f32 %v601_v26, %v544_v4  ;;  %v603_v35 = vadd.f32 1.0, %v1686_v32 }
 0x129   : > { %1433 = vmatprep.mubr.msk.f32.mxu1 %vm1790_vm0, %v1791_v6  ;;  %v621_v56 = vmul.f32 %v602_v30, %v545_v29 }
 0x12a   : > { %v622_v36 = vmul.f32 %v603_v35, %v546_v34 }
 0x12c   : > { %1434 = vmatmul.mubr.f32.gmra.mrb[40].mxu1 %v615_v2 }
 0x12d   : > { %1436 = vmatprep.mubr.msk.f32.mxu1 %vm1790_vm0, %v1791_v6 }
 0x130   : > { %1437 = vmatmul.mubr.f32.gmra.mrb[42].mxu1 %v616_v12 }
 0x131   : > { %1439 = vmatprep.mubr.msk.f32.mxu1 %vm1790_vm0, %v1791_v6 }
 0x134   : > { %1440 = vmatmul.mubr.f32.gmra.mrb[44].mxu1 %v617_v18 }
 0x135   : > { %1442 = vmatprep.mubr.msk.f32.mxu1 %vm1790_vm0, %v1791_v6 }
 0x138   : > { %1443 = vmatmul.mubr.f32.gmra.mrb[46].mxu1 %v618_v24 }
 0x139   : > { %1445 = vmatprep.mubr.msk.f32.mxu1 %vm1790_vm0, %v1791_v6 }
 0x13c   : > { %1446 = vmatmul.mubr.f32.gmra.mrb[48].mxu1 %v619_v27 }
 0x13d   : > { %1448 = vmatprep.mubr.msk.f32.mxu1 %vm1790_vm0, %v1791_v6 }
 0x140   : > { %1449 = vmatmul.mubr.f32.gmra.mrb[50].mxu1 %v620_v31 }
 0x141   : > { %1451 = vmatprep.mubr.msk.f32.mxu1 %vm1790_vm0, %v1791_v6 }
 0x144   : > { %1452 = vmatmul.mubr.f32.gmra.mrb[52].mxu1 %v621_v56 }
 0x145   : > { %1454 = vmatprep.mubr.msk.f32.mxu1 %vm1790_vm0, %v1791_v6 }
 0x148   : > { %1455 = vmatmul.mubr.f32.gmra.mrb[54].mxu1 %v622_v36 }
 0x1d3   : > { %v712_v47 = vpop.f32.mrb[18].mxu1 }
 0x1d4   : > { %v713_v48 = vadd.f32 %v2190_v46, %v712_v47  ;;  %v1402_v49 = vpop.f32.mrb[19].mxu1 }
 0x1d6   : > { %v825_v3 = vmul.f32 0.70710677, %v713_v48  ;;  %v806_v62 = vmul.f32 0.5, %v713_v48 }
 0x1d7   : > { %v717_v50 = vpop.f32.mrb[20].mxu1 }
 0x1d8   : > { %1687 = verf.f32 %v825_v3  ;;  %v718_v51 = vadd.f32 %v2190_v46, %v717_v50  ;;  %v1405_v23 = vpop.f32.mrb[21].mxu1 }
 0x1da   : > { %v826_v52 = vmul.f32 0.70710677, %v718_v51  ;;  %v807_v9 = vmul.f32 0.5, %v718_v51 }
 0x1db   : > { %v722_v53 = vpop.f32.mrb[22].mxu1 }
 0x1dc   : > { %1689 = verf.f32 %v826_v52  ;;  %v723_v54 = vadd.f32 %v2190_v46, %v722_v53  ;;  %v1408_v55 = vpop.f32.mrb[23].mxu1 }
 0x1de   : > { %v827_v57 = vmul.f32 0.70710677, %v723_v54  ;;  %v808_v19 = vmul.f32 0.5, %v723_v54 }
 0x1df   : > { %v727_v33 = vpop.f32.mrb[24].mxu1 }
 0x1e0   : > { %1691 = verf.f32 %v827_v57  ;;  %v728_v58 = vadd.f32 %v2190_v46, %v727_v33  ;;  %v1411_v59 = vpop.f32.mrb[25].mxu1 }
 0x1e2   : > { %v1688_v60 = vpop.eup %1687  ;;  %v828_v61 = vmul.f32 0.70710677, %v728_v58  ;;  %v809_v28 = vmul.f32 0.5, %v728_v58 }
 0x1e3   : > { %v863_v0 = vadd.f32 1.0, %v1688_v60  ;;  %v732_v63 = vpop.f32.mrb[26].mxu1 }
 0x1e4   : > { %1693 = verf.f32 %v828_v61  ;;  %v733_v43 = vadd.f32 %v2190_v46, %v732_v63  ;;  %v1414_v1 = vpop.f32.mrb[27].mxu1 }
 0x1e5   : > { %v882_v2 = vmul.f32 %v863_v0, %v806_v62 }
 0x1e6   : > { %v1690_v5 = vpop.eup %1689  ;;  %v829_v8 = vmul.f32 0.70710677, %v733_v43  ;;  %v810_v36 = vmul.f32 0.5, %v733_v43 }
 0x1e7   : > { %v864_v10 = vadd.f32 1.0, %v1690_v5  ;;  %v737_v12 = vpop.f32.mrb[28].mxu1  ;;  %1490 = vmatmul.mubr.f32.vlgmr.msra.gmra.mrb[20].mxu0 %v882_v2 }
 0x1e8   : > { %1695 = verf.f32 %v829_v8  ;;  %v738_v13 = vadd.f32 %v2190_v46, %v737_v12  ;;  %v1417_v14 = vpop.f32.mrb[29].mxu1  ;;  %1492 = vmatprep.mubr.msk.f32.mxu0 %vm1790_vm0, %v1791_v6 }
 0x1e9   : > { %v883_v15 = vmul.f32 %v864_v10, %v807_v9 }
 0x1ea   : > { %v1692_v16 = vpop.eup %1691  ;;  %v830_v18 = vmul.f32 0.70710677, %v738_v13  ;;  %v811_v41 = vmul.f32 0.5, %v738_v13 }
 0x1eb   : > { %v865_v20 = vadd.f32 1.0, %v1692_v16  ;;  %v742_v22 = vpop.f32.mrb[30].mxu1  ;;  %1493 = vmatmul.mubr.f32.gmra.mrb[22].mxu0 %v883_v15 }
 0x1ec   : > { %1697 = verf.f32 %v830_v18  ;;  %v743_v24 = vadd.f32 %v2190_v46, %v742_v22  ;;  %v1420_v25 = vpop.f32.mrb[31].mxu1  ;;  %1495 = vmatprep.mubr.msk.f32.mxu0 %vm1790_vm0, %v1791_v6 }
 0x1ed   : > { %v884_v4 = vmul.f32 %v865_v20, %v808_v19 }
 0x1ee   : > { %v1694_v26 = vpop.eup %1693  ;;  %v831_v27 = vmul.f32 0.70710677, %v743_v24  ;;  %v812_v3 = vmul.f32 0.5, %v743_v24 }
 0x1ef   : > { %v866_v29 = vadd.f32 1.0, %v1694_v26  ;;  %v747_v30 = vpop.f32.mrb[32].mxu1  ;;  %1496 = vmatmul.mubr.f32.gmra.mrb[24].mxu0 %v884_v4 }
 0x1f0   : > { %1699 = verf.f32 %v831_v27  ;;  %v748_v31 = vadd.f32 %v2190_v46, %v747_v30  ;;  %v1423_v32 = vpop.f32.mrb[33].mxu1  ;;  %1498 = vmatprep.mubr.msk.f32.mxu0 %vm1790_vm0, %v1791_v6 }
 0x1f1   : > { %v885_v34 = vmul.f32 %v866_v29, %v809_v28 }
 0x1f2   : > { %v1696_v35 = vpop.eup %1695  ;;  %v832_v56 = vmul.f32 0.70710677, %v748_v31  ;;  %v813_v57 = vmul.f32 0.5, %v748_v31 }
 0x1f3   : > { %v867_v7 = vadd.f32 1.0, %v1696_v35  ;;  %v752_v37 = vpop.f32.mrb[34].mxu1  ;;  %1499 = vmatmul.mubr.f32.gmra.mrb[26].mxu0 %v885_v34 }
 0x1f4   : > { %1701 = verf.f32 %v832_v56  ;;  %v753_v11 = vadd.f32 %v2190_v46, %v752_v37  ;;  %v1426_v21 = vpop.f32.mrb[35].mxu1  ;;  %1501 = vmatprep.mubr.msk.f32.mxu0 %vm1790_vm0, %v1791_v6 }
 0x1f5   : > { %v886_v38 = vmul.f32 %v867_v7, %v810_v36 }
 0x1f6   : > { %v1698_v39 = vpop.eup %1697  ;;  %v833_v40 = vmul.f32 0.70710677, %v753_v11  ;;  %v814_v63 = vmul.f32 0.5, %v753_v11 }
 0x1f7   : > { %v868_v42 = vadd.f32 1.0, %v1698_v39  ;;  %v757_v44 = vpop.f32.mrb[36].mxu1  ;;  %1502 = vmatmul.mubr.f32.gmra.mrb[28].mxu0 %v886_v38 }
 0x1f8   : > { %1703 = verf.f32 %v833_v40  ;;  %v758_v45 = vadd.f32 %v2190_v46, %v757_v44  ;;  %v1429_v17 = vpop.f32.mrb[37].mxu1  ;;  %1504 = vmatprep.mubr.msk.f32.mxu0 %vm1790_vm0, %v1791_v6 }
 0x1f9   : > { %v887_v47 = vmul.f32 %v868_v42, %v811_v41 }
 0x1fa   : > { %v1700_v48 = vpop.eup %1699  ;;  %v834_v49 = vmul.f32 0.70710677, %v758_v45  ;;  %v815_v12 = vmul.f32 0.5, %v758_v45 }
 0x1fb   : > { %v869_v50 = vadd.f32 1.0, %v1700_v48  ;;  %v762_v51 = vpop.f32.mrb[38].mxu1  ;;  %1505 = vmatmul.mubr.f32.gmra.mrb[30].mxu0 %v887_v47 }
 0x1fc   : > { %1705 = verf.f32 %v834_v49  ;;  %v763_v23 = vadd.f32 %v2190_v46, %v762_v51  ;;  %v1432_v52 = vpop.f32.mrb[39].mxu1  ;;  %1507 = vmatprep.mubr.msk.f32.mxu0 %vm1790_vm0, %v1791_v6 }
 0x1fd   : > { %v888_v53 = vmul.f32 %v869_v50, %v812_v3 }
 0x1fe   : > { %v1702_v54 = vpop.eup %1701  ;;  %v835_v55 = vmul.f32 0.70710677, %v763_v23  ;;  %v816_v22 = vmul.f32 0.5, %v763_v23 }
 0x1ff   : > { %v870_v33 = vadd.f32 1.0, %v1702_v54  ;;  %v767_v58 = vpop.f32.mrb[40].mxu1  ;;  %1508 = vmatmul.mubr.f32.gmra.mrb[32].mxu0 %v888_v53 }
 0x200   : > { %1707 = verf.f32 %v835_v55  ;;  %v768_v59 = vadd.f32 %v2190_v46, %v767_v58  ;;  %v1435_v60 = vpop.f32.mrb[41].mxu1  ;;  %1510 = vmatprep.mubr.msk.f32.mxu0 %vm1790_vm0, %v1791_v6 }
 0x201   : > { %v889_v61 = vmul.f32 %v870_v33, %v813_v57 }
 0x202   : > { %v1704_v62 = vpop.eup %1703  ;;  %v836_v0 = vmul.f32 0.70710677, %v768_v59  ;;  %v817_v30 = vmul.f32 0.5, %v768_v59 }
 0x203   : > { %v871_v43 = vadd.f32 1.0, %v1704_v62  ;;  %v772_v1 = vpop.f32.mrb[42].mxu1  ;;  %1511 = vmatmul.mubr.f32.gmra.mrb[34].mxu0 %v889_v61 }
 0x204   : > { %1709 = verf.f32 %v836_v0  ;;  %v773_v2 = vadd.f32 %v2190_v46, %v772_v1  ;;  %v1438_v5 = vpop.f32.mrb[43].mxu1  ;;  %1513 = vmatprep.mubr.msk.f32.mxu0 %vm1790_vm0, %v1791_v6 }
 0x205   : > { %v890_v8 = vmul.f32 %v871_v43, %v814_v63 }
 0x206   : > { %v1706_v9 = vpop.eup %1705  ;;  %v837_v10 = vmul.f32 0.70710677, %v773_v2  ;;  %v818_v37 = vmul.f32 0.5, %v773_v2 }
 0x207   : > { %v872_v13 = vadd.f32 1.0, %v1706_v9  ;;  %v777_v14 = vpop.f32.mrb[44].mxu1  ;;  %1514 = vmatmul.mubr.f32.gmra.mrb[36].mxu0 %v890_v8 }
 0x208   : > { %1711 = verf.f32 %v837_v10  ;;  %v778_v15 = vadd.f32 %v2190_v46, %v777_v14  ;;  %v1441_v16 = vpop.f32.mrb[45].mxu1  ;;  %1516 = vmatprep.mubr.msk.f32.mxu0 %vm1790_vm0, %v1791_v6 }
 0x209   : > { %v891_v18 = vmul.f32 %v872_v13, %v815_v12  ;;  %v2253_v12 = vld [vmem:[%s2353_s6] ss:$0 sm:$0xff] }
 0x20a   : > { %v1708_v19 = vpop.eup %1707  ;;  %v838_v20 = vmul.f32 0.70710677, %v778_v15  ;;  %v819_v44 = vmul.f32 0.5, %v778_v15 }
 0x20b   : > { %v873_v24 = vadd.f32 1.0, %v1708_v19  ;;  %v782_v25 = vpop.f32.mrb[46].mxu1  ;;  %1517 = vmatmul.mubr.f32.gmra.mrb[38].mxu0 %v891_v18 }
 0x20c   : > { %1713 = verf.f32 %v838_v20  ;;  %v783_v4 = vadd.f32 %v2190_v46, %v782_v25  ;;  %v1444_v26 = vpop.f32.mrb[47].mxu1  ;;  %1519 = vmatprep.mubr.msk.f32.mxu0 %vm1790_vm0, %v1791_v6 }
 0x20d   : > { %v892_v27 = vmul.f32 %v873_v24, %v816_v22 }
 0x20e   : > { %v1710_v28 = vpop.eup %1709  ;;  %v839_v29 = vmul.f32 0.70710677, %v783_v4  ;;  %v820_v51 = vmul.f32 0.5, %v783_v4 }
 0x20f   : > { %v874_v31 = vadd.f32 1.0, %v1710_v28  ;;  %v787_v32 = vpop.f32.mrb[48].mxu1  ;;  %1520 = vmatmul.mubr.f32.gmra.mrb[40].mxu0 %v892_v27 }
 0x210   : > { %1715 = verf.f32 %v839_v29  ;;  %v788_v34 = vadd.f32 %v2190_v46, %v787_v32  ;;  %v1447_v35 = vpop.f32.mrb[49].mxu1  ;;  %1522 = vmatprep.mubr.msk.f32.mxu0 %vm1790_vm0, %v1791_v6 }
 0x211   : > { %v893_v56 = vmul.f32 %v874_v31, %v817_v30 }
 0x212   : > { %v1712_v36 = vpop.eup %1711  ;;  %v840_v7 = vmul.f32 0.70710677, %v788_v34  ;;  %v821_v58 = vmul.f32 0.5, %v788_v34 }
 0x213   : > { %v875_v11 = vadd.f32 1.0, %v1712_v36  ;;  %v792_v21 = vpop.f32.mrb[50].mxu1  ;;  %1523 = vmatmul.mubr.f32.gmra.mrb[42].mxu0 %v893_v56 }
 0x214   : > { %1717 = verf.f32 %v840_v7  ;;  %v793_v38 = vadd.f32 %v2190_v46, %v792_v21  ;;  %v1450_v39 = vpop.f32.mrb[51].mxu1  ;;  %1525 = vmatprep.mubr.msk.f32.mxu0 %vm1790_vm0, %v1791_v6 }
 0x215   : > { %v894_v40 = vmul.f32 %v875_v11, %v818_v37 }
 0x216   : > { %v1714_v41 = vpop.eup %1713  ;;  %v841_v42 = vmul.f32 0.70710677, %v793_v38  ;;  %v822_v62 = vmul.f32 0.5, %v793_v38 }
 0x217   : > { %v876_v45 = vadd.f32 1.0, %v1714_v41  ;;  %v797_v17 = vpop.f32.mrb[52].mxu1  ;;  %1526 = vmatmul.mubr.f32.gmra.mrb[44].mxu0 %v894_v40 }
 0x218   : > { %1719 = verf.f32 %v841_v42  ;;  %v798_v47 = vadd.f32 %v2190_v46, %v797_v17  ;;  %v1453_v48 = vpop.f32.mrb[53].mxu1  ;;  %1528 = vmatprep.mubr.msk.f32.mxu0 %vm1790_vm0, %v1791_v6 }
 0x219   : > { %v895_v49 = vmul.f32 %v876_v45, %v819_v44 }
 0x21a   : > { %v1716_v3 = vpop.eup %1715  ;;  %v842_v50 = vmul.f32 0.70710677, %v798_v47  ;;  %v823_v43 = vmul.f32 0.5, %v798_v47 }
 0x21b   : > { %v877_v23 = vadd.f32 1.0, %v1716_v3  ;;  %v802_v52 = vpop.f32.mrb[54].mxu1  ;;  %1529 = vmatmul.mubr.f32.gmra.mrb[46].mxu0 %v895_v49 }
 0x21c   : > { %1721 = verf.f32 %v842_v50  ;;  %v803_v53 = vadd.f32 %v2190_v46, %v802_v52  ;;  %v1456_v54 = vpop.f32.mrb[55].mxu1  ;;  %1531 = vmatprep.mubr.msk.f32.mxu0 %vm1790_vm0, %v1791_v6 }
 0x21d   : > { %v896_v55 = vmul.f32 %v877_v23, %v820_v51 }
 0x21e   : > { %v1718_v57 = vpop.eup %1717  ;;  %v843_v33 = vmul.f32 0.70710677, %v803_v53  ;;  %v824_v8 = vmul.f32 0.5, %v803_v53 }
 0x21f   : > { %v878_v59 = vadd.f32 1.0, %v1718_v57  ;;  %1532 = vmatmul.mubr.f32.gmra.mrb[48].mxu0 %v896_v55 }
 0x220   : > { %1723 = verf.f32 %v843_v33  ;;  %1534 = vmatprep.mubr.msk.f32.mxu0 %vm1790_vm0, %v1791_v6 }
 0x221   : > { %v897_v60 = vmul.f32 %v878_v59, %v821_v58 }
 0x222   : > { %v1720_v61 = vpop.eup %1719 }
 0x223   : > { %v879_v0 = vadd.f32 1.0, %v1720_v61  ;;  %1535 = vmatmul.mubr.f32.gmra.mrb[50].mxu0 %v897_v60 }
 0x224   : > { %1537 = vmatprep.mubr.msk.f32.mxu0 %vm1790_vm0, %v1791_v6 }
 0x225   : > { %v898_v46 = vmul.f32 %v879_v0, %v822_v62 }
 0x226   : > { %v1722_v63 = vpop.eup %1721 }
 0x227   : > { %v880_v1 = vadd.f32 1.0, %v1722_v63  ;;  %1538 = vmatmul.mubr.f32.gmra.mrb[52].mxu0 %v898_v46 }
 0x228   : > { %1540 = vmatprep.mubr.msk.f32.mxu0 %vm1790_vm0, %v1791_v6 }
 0x229   : > { %v899_v2 = vmul.f32 %v880_v1, %v823_v43 }
 0x22a   : > { %v1724_v5 = vpop.eup %1723 }
 0x22b   : > { %v881_v9 = vadd.f32 1.0, %v1724_v5  ;;  %1541 = vmatmul.mubr.f32.gmra.mrb[54].mxu0 %v899_v2 }
 0x22c   : > { %1543 = vmatprep.mubr.msk.f32.mxu0 %vm1790_vm0, %v1791_v6 }
 0x22d   : > { %v900_v10 = vmul.f32 %v881_v9, %v824_v8 }
 0x22f   : > { %1544 = vmatmul.mubr.f32.gmra.mrb[56].mxu0 %v900_v10 }
 0x2ba   : > { %v990_v13 = vpop.f32.mrb[20].mxu0 }
 0x2bb   : > { %v991_v14 = vadd.f32 %v2253_v12, %v990_v13  ;;  %v1491_v15 = vpop.f32.mrb[21].mxu0 }
 0x2bd   : > { %1084 = vst [vmem:[%s2256_s14] sm:$0xff] %v991_v14 }
 0x2be   : > { %v995_v6 = vpop.f32.mrb[22].mxu0 }
 0x2bf   : > { %v996_v16 = vadd.f32 %v2253_v12, %v995_v6  ;;  %v1494_v18 = vpop.f32.mrb[23].mxu0 }
 0x2c1   : > { %1085 = vst [vmem:[%s2256_s14 + $0x8] sm:$0xff] %v996_v16 }
 0x2c2   : > { %v1000_v19 = vpop.f32.mrb[24].mxu0 }
 0x2c3   : > { %v1001_v20 = vadd.f32 %v2253_v12, %v1000_v19  ;;  %v1497_v22 = vpop.f32.mrb[25].mxu0 }
 0x2c5   : > { %1086 = vst [vmem:[%s2256_s14 + $0x10] sm:$0xff] %v1001_v20 }
 0x2c6   : > { %v1005_v24 = vpop.f32.mrb[26].mxu0 }
 0x2c7   : > { %v1006_v25 = vadd.f32 %v2253_v12, %v1005_v24  ;;  %v1500_v4 = vpop.f32.mrb[27].mxu0 }
 0x2c9   : > { %1087 = vst [vmem:[%s2256_s14 + $0x18] sm:$0xff] %v1006_v25 }
 0x2ca   : > { %v1010_v26 = vpop.f32.mrb[28].mxu0 }
 0x2cb   : > { %v1011_v27 = vadd.f32 %v2253_v12, %v1010_v26  ;;  %v1503_v28 = vpop.f32.mrb[29].mxu0 }
 0x2cd   : > { %1088 = vst [vmem:[%s2256_s14 + $0x20] sm:$0xff] %v1011_v27 }
 0x2ce   : > { %v1015_v29 = vpop.f32.mrb[30].mxu0 }
 0x2cf   : > { %v1016_v30 = vadd.f32 %v2253_v12, %v1015_v29  ;;  %v1506_v31 = vpop.f32.mrb[31].mxu0 }
 0x2d1   : > { %1089 = vst [vmem:[%s2256_s14 + $0x28] sm:$0xff] %v1016_v30 }
 0x2d2   : > { %v1020_v32 = vpop.f32.mrb[32].mxu0 }
 0x2d3   : > { %v1021_v34 = vadd.f32 %v2253_v12, %v1020_v32  ;;  %v1509_v35 = vpop.f32.mrb[33].mxu0 }
 0x2d5   : > { %1090 = vst [vmem:[%s2256_s14 + $0x30] sm:$0xff] %v1021_v34 }
 0x2d6   : > { %v1025_v56 = vpop.f32.mrb[34].mxu0 }
 0x2d7   : > { %v1026_v36 = vadd.f32 %v2253_v12, %v1025_v56  ;;  %v1512_v7 = vpop.f32.mrb[35].mxu0 }
 0x2d9   : > { %1091 = vst [vmem:[%s2256_s14 + $0x38] sm:$0xff] %v1026_v36 }
 0x2da   : > { %v1030_v37 = vpop.f32.mrb[36].mxu0 }
 0x2db   : > { %v1031_v11 = vadd.f32 %v2253_v12, %v1030_v37  ;;  %v1515_v21 = vpop.f32.mrb[37].mxu0 }
 0x2dd   : > { %1092 = vst [vmem:[%s2256_s14 + $0x40] sm:$0xff] %v1031_v11 }
 0x2de   : > { %v1035_v38 = vpop.f32.mrb[38].mxu0 }
 0x2df   : > { %v1036_v39 = vadd.f32 %v2253_v12, %v1035_v38  ;;  %v1518_v40 = vpop.f32.mrb[39].mxu0 }
 0x2e1   : > { %1093 = vst [vmem:[%s2256_s14 + $0x48] sm:$0xff] %v1036_v39 }
 0x2e2   : > { %v1040_v41 = vpop.f32.mrb[40].mxu0 }
 0x2e3   : > { %v1041_v42 = vadd.f32 %v2253_v12, %v1040_v41  ;;  %v1521_v44 = vpop.f32.mrb[41].mxu0 }
 0x2e5   : > { %1094 = vst [vmem:[%s2256_s14 + $0x50] sm:$0xff] %v1041_v42 }
 0x2e6   : > { %v1045_v45 = vpop.f32.mrb[42].mxu0 }
 0x2e7   : > { %v1046_v17 = vadd.f32 %v2253_v12, %v1045_v45  ;;  %v1524_v47 = vpop.f32.mrb[43].mxu0 }
 0x2e9   : > { %1095 = vst [vmem:[%s2256_s14 + $0x58] sm:$0xff] %v1046_v17 }
 0x2ea   : > { %v1050_v48 = vpop.f32.mrb[44].mxu0 }
 0x2eb   : > { %v1051_v49 = vadd.f32 %v2253_v12, %v1050_v48  ;;  %v1527_v3 = vpop.f32.mrb[45].mxu0 }
 0x2ed   : > { %1096 = vst [vmem:[%s2256_s14 + $0x60] sm:$0xff] %v1051_v49 }
 0x2ee   : > { %v1055_v50 = vpop.f32.mrb[46].mxu0 }
 0x2ef   : > { %v1056_v51 = vadd.f32 %v2253_v12, %v1055_v50  ;;  %v1530_v23 = vpop.f32.mrb[47].mxu0 }
 0x2f1   : > { %1097 = vst [vmem:[%s2256_s14 + $0x68] sm:$0xff] %v1056_v51 }
 0x2f2   : > { %v1060_v52 = vpop.f32.mrb[48].mxu0 }
 0x2f3   : > { %v1061_v53 = vadd.f32 %v2253_v12, %v1060_v52  ;;  %v1533_v54 = vpop.f32.mrb[49].mxu0 }
 0x2f5   : > { %1098 = vst [vmem:[%s2256_s14 + $0x70] sm:$0xff] %v1061_v53 }
 0x2f6   : > { %v1065_v55 = vpop.f32.mrb[50].mxu0 }
 0x2f7   : > { %v1066_v57 = vadd.f32 %v2253_v12, %v1065_v55  ;;  %v1536_v33 = vpop.f32.mrb[51].mxu0 }
 0x2f9   : > { %1099 = vst [vmem:[%s2256_s14 + $0x78] sm:$0xff] %v1066_v57 }
 0x2fa   : > { %v1070_v58 = vpop.f32.mrb[52].mxu0 }
 0x2fb   : > { %v1071_v59 = vadd.f32 %v2253_v12, %v1070_v58  ;;  %v1539_v60 = vpop.f32.mrb[53].mxu0 }
 0x2fd   : > { %1100 = vst [vmem:[%s2256_s14 + $0x80] sm:$0xff] %v1071_v59 }
 0x2fe   : > { %v1075_v61 = vpop.f32.mrb[54].mxu0 }
 0x2ff   : > { %v1076_v62 = vadd.f32 %v2253_v12, %v1075_v61  ;;  %v1542_v0 = vpop.f32.mrb[55].mxu0 }
 0x301   : > { %1101 = vst [vmem:[%s2256_s14 + $0x88] sm:$0xff] %v1076_v62 }
 0x302   : > { %v1080_v46 = vpop.f32.mrb[56].mxu0 }
 0x303   : > { %v1081_v63 = vadd.f32 %v2253_v12, %v1080_v46  ;;  %v1545_v43 = vpop.f32.mrb[57].mxu0 }
 0x305   : > { %1102 = vst [vmem:[%s2256_s14 + $0x90] sm:$0xff] %v1081_v63 }
 0x306   : > { %1738 = shalt.err (!%p1735_p3)
}
 0x307   : > { %s1739_s29 = scalar_lea.hbm %s2298_s19, 2432  ;;  %s1743_s13 = scalar_lea.hbm %s2354_s7, 4864 }
 0x308   : > { %p1740_p4 = scmp.ne.s32.totalorder %s2298_s19, %s1739_s29  ;;  %p1744_p9 = scmp.lt.u32.totalorder %s2298_s19, %s2354_s7 }
 0x309   : > { %p1745_p10 = scmp.lt.u32.totalorder %s1743_s13, %s1739_s29  ;;  %p1747_p12 = scmp.lt.u32.totalorder %s1739_s29, %s2298_s19 }
 0x30a   : > { %p1741_p7 = pnand %p1740_p4, %p1873_p5 }
 0x30b   : > { %p1746_p11 = por %p1745_p10, %p1744_p9 }
 0x30c   : > { %p1742_p8 = pneg %p1741_p7 }
 0x30d   : > { %p1748_p13 = por %p1747_p12, %p1746_p11 }
 0x30f   : > { %p1749_p0 = pnand %p1748_p13, %p1742_p8 }
 0x311   : > { %1752 = shalt.err (!%p1749_p0)
}
 0x312   : > { %s1793_s18 = smov 128   ;;  %s1794_s15 = smov 8  }
 0x313   : > { %1605 = dma.vmem_to_hbm [thread:$0]  (%p1873_p5), %s2300_s17, 2432, %s2298_s19, %s2306_s28, %s1793_s18, %s1793_s18, %s1794_s15  }
 0x314 PF: > { %p1611_p1 = scmp.ge.s32.totalorder %s1787_s27, 2  ;;  %s1132_s20 = sand.u32 1, %s1775_s24  }
 0x315   : > { %s1133_s21 = scalar_lea.sflag [#allocation3], %s1132_s20 }
 0x316   : > { %p1608_p2 = pnand %p1611_p1, %p1877_p6 }
 0x318   : > { %1770 = dma.done.wait (!%p1608_p2), %s1133_s21, 2432  }
 0x319   : > { %1772 = vsyncadd (!%p1608_p2), %s1133_s21, 4294964864  ;;  %p17_p3 = scmp.ge.s32.totalorder %s1860_s30, 4   ;;  %s2357_s24 = smov %s1779_s25 }
 0x31a   : > { %s2358_s25 = smov %s1783_s26  ;;  %s2359_s26 = smov %s1871_s10 }
 0x31b   : > { %s2360_s27 = smov %s1860_s30  ;;  %19 = sbr.rel (!%p17_p3) target bundleno = 3 (0x3), region = 83 }
 0x322   :  { %1138 = vsyncpa [#allocation3], 1 }
 0x323   :  { %1140 = vsyncpa [#allocation3 + $0x1], 1 }

// kernel: tpu_custom_call.1
= control target key start
LH: loop header
LB: loop body
LE: loop exit
PB: predicated region body
PF: predicated region fallthrough
CT: control target
= control target key end

     0   :  { %12 = vsyncpa [#allocation3], 0  ;;  %s2347_s0 = inlined_call_operand.vmem [shape: f32[304,32], index: 0, kind: input, shape index: {}]   ;;  %s2348_s1 = inlined_call_operand.vmem [shape: f32[32,128], index: 1, kind: input, shape index: {}]   ;;  %s2349_s2 = inlined_call_operand.vmem [shape: f32[1,128], index: 2, kind: input, shape index: {}]   ;;  %s2350_s3 = inlined_call_operand.vmem [shape: f32[128,128], index: 3, kind: input, shape index: {}]   ;;  %s2351_s4 = inlined_call_operand.vmem [shape: f32[1,128], index: 4, kind: input, shape index: {}]   ;;  %s2352_s5 = inlined_call_operand.vmem [shape: f32[128,128], index: 5, kind: input, shape index: {}]   ;;  %s2353_s6 = inlined_call_operand.vmem [shape: f32[1,128], index: 6, kind: input, shape index: {}]   ;;  %s2354_s7 = inlined_call_operand.hbm [shape: f32[304,128], index: 7, kind: output, shape index: {}]  }
   0x1   :  { %14 = vsyncpa [#allocation3 + $0x1], 0  ;;  %s1835_s24 = smov 0   ;;  %s1837_s25 = smov 0  }
   0x2   :  { %s1839_s26 = smov 0   ;;  %s1841_s27 = smov 0  }
   0x3 LB: > { %s1856_s28 = sadd.s32 4294967295, %s1787_s27   ;;  %s1179_s29 = sadd.s32 4294967294, %s1787_s27   ;;  %s1787_s27 = sphi %s1841_s27, %s2360_s27   ;;  %s1783_s26 = sphi %s1839_s26, %s2359_s26   ;;  %s1779_s25 = sphi %s1837_s25, %s2358_s25   ;;  %s1775_s24 = sphi %s1835_s24, %s2357_s24  }
   0x4   : > { %s1860_s30 = sadd.s32 1, %s1787_s27   ;;  %s179_s8 = sadd.s32 1, %s1783_s26 }
   0x5   : > { %s176_s9 = ssub.s32 %s1787_s27, %s1860_s30  ;;  %p189_p0 = scmp.ne.s32.totalorder %s1783_s26, %s1779_s25 }
   0x6   : > { %p177_p1 = scmp.eq.s32.totalorder %s176_s9, 0  ;;  %p190_p2 = scmp.eq.s32.totalorder %s1856_s28, 1 }
   0x7   : > { %p195_p3 = scmp.ne.s32.totalorder %s1779_s25, %s1775_s24  ;;  %p196_p4 = scmp.eq.s32.totalorder %s1179_s29, 1 }
   0x8   : > { %s1871_s10 = scalar_select %p177_p1, %s1783_s26, %s179_s8  }
   0x9   : > { %p1873_p5 = por %p190_p2, %p189_p0  ;;  %p1877_p6 = por %p196_p4, %p195_p3 }
   0xa   : > { %p1182_p7 = scmp.ge.s32.totalorder %s1787_s27, 1  ;;  %p241_p8 = scmp.lt.s32.totalorder %s1787_s27, 3 }
   0xc   : > { %p242_p9 = pnand %p1182_p7, %p241_p8 }
   0xd   : > { %v299_v0 = vld [vmem:[%s2348_s1] sm:$0xff] (!%p242_p9)  ;;  %v300_v1 = vld [vmem:[%s2348_s1 + $0x8] sm:$0xff] (!%p242_p9)  ;;  %v301_v2 = vld [vmem:[%s2348_s1 + $0x10] sm:$0xff] (!%p242_p9)  ;;  %v1789_v3 = vmov (!%p242_p9), 0.0|0.0   ;;  %vm1790_vm0 = vmmov (!%p242_p9), 0   ;;  %v1791_v6 = vmov (!%p242_p9), 0.0  }
   0xe   : > { %245 = sbr.rel (%p242_p9) target bundleno = 788 (0x314), region = 48  ;;  %1546 = vmatprep.subr.bf16.mxu0 (!%p242_p9), %v1789_v3  ;;  %v1547_v4 = vpack.c.bf16 (!%p242_p9), %v300_v1, %v299_v0  ;;  %v302_v5 = vld [vmem:[%s2348_s1 + $0x18] sm:$0xff] (!%p242_p9)  ;;  %1311 = vmatprep.mubr.msk.f32.mxu0 (!%p242_p9), %vm1790_vm0, %v1791_v6  ;;  %v623_v8 = vld [vmem:[%s2350_s3] sm:$0xff] (!%p242_p9)  ;;  %v624_v9 = vld [vmem:[%s2350_s3 + $0x8] sm:$0xff] (!%p242_p9)  ;;  %vm310_vm1 = vcmask (!%p242_p9), 261120   ;;  %s270_s29 = sand.u32 (!%p242_p9), 1, %s1779_s25  }
   0xf   : > { %s273_s21 = smul.u32 (!%p242_p9), 19, %s1856_s28  ;;  %1600 = vmatprep.subr.bf16.mxu1 (!%p242_p9), %v1789_v3  ;;  %1341 = vmatprep.mubr.msk.f32.mxu1 (!%p242_p9), %vm1790_vm0, %v1791_v6  ;;  %v1550_v7 = vpack.c.bf16 (!%p242_p9), %v302_v5, %v301_v2  ;;  %v1553_v11 = vpack.c.bf16 (!%p242_p9), %v624_v9, %v623_v8  ;;  %v625_v12 = vld [vmem:[%s2350_s3 + $0x10] sm:$0xff] (!%p242_p9)  ;;  %v626_v13 = vld [vmem:[%s2350_s3 + $0x18] sm:$0xff] (!%p242_p9)  ;;  %v627_v18 = vld [vmem:[%s2350_s3 + $0x20] sm:$0xff] (!%p242_p9) }
  0x10   : > { %1548 = vmatpush3.bf16.msra.mxu0 (!%p242_p9), %v1547_v4  ;;  %1602 = vmatpush3.bf16.msra.mxu1 (!%p242_p9), %v1547_v4  ;;  %v1556_v17 = vpack.c.bf16 (!%p242_p9), %v626_v13, %v625_v12  ;;  %v628_v19 = vld [vmem:[%s2350_s3 + $0x28] sm:$0xff] (!%p242_p9)  ;;  %v629_v23 = vld [vmem:[%s2350_s3 + $0x30] sm:$0xff] (!%p242_p9)  ;;  %v630_v24 = vld [vmem:[%s2350_s3 + $0x38] sm:$0xff] (!%p242_p9)  ;;  %s1604_s8 = smul.u32 (!%p242_p9), 152, %s270_s29 }
  0x11   : > { %p274_p10 = scmp.lt.s32.totalorder (!%p242_p9), %s273_s21, 37  ;;  %1549 = vmatprep.subr.bf16.mxu0 (!%p242_p9), %v1789_v3  ;;  %1601 = vmatprep.subr.bf16.mxu1 (!%p242_p9), %v1789_v3  ;;  %v1559_v22 = vpack.c.bf16 (!%p242_p9), %v628_v19, %v627_v18  ;;  %v1562_v27 = vpack.c.bf16 (!%p242_p9), %v630_v24, %v629_v23  ;;  %v631_v39 = vld [vmem:[%s2350_s3 + $0x40] sm:$0xff] (!%p242_p9)  ;;  %v632_v40 = vld [vmem:[%s2350_s3 + $0x48] sm:$0xff] (!%p242_p9)  ;;  %v633_v42 = vld [vmem:[%s2350_s3 + $0x50] sm:$0xff] (!%p242_p9)  ;;  %s1209_s16 = smul.u32 (!%p242_p9), 2432, %s1856_s28 }
  0x12   : > { %v1565_v41 = vpack.c.bf16 (!%p242_p9), %v632_v40, %v631_v39  ;;  %v634_v43 = vld [vmem:[%s2350_s3 + $0x58] sm:$0xff] (!%p242_p9)  ;;  %v635_v45 = vld [vmem:[%s2350_s3 + $0x60] sm:$0xff] (!%p242_p9)  ;;  %v636_v46 = vld [vmem:[%s2350_s3 + $0x68] sm:$0xff] (!%p242_p9)  ;;  %s2256_s14 = scalar_lea.vmem (!%p242_p9), [#allocation2], %s1604_s8  ;;  %s2306_s28 = scalar_lea.sflag (!%p242_p9), [#allocation3], %s270_s29 }
  0x13   : > { %v1568_v44 = vpack.c.bf16 (!%p242_p9), %v634_v43, %v633_v42  ;;  %v1571_v47 = vpack.c.bf16 (!%p242_p9), %v636_v46, %v635_v45  ;;  %v637_v48 = vld [vmem:[%s2350_s3 + $0x70] sm:$0xff] (!%p242_p9)  ;;  %v638_v49 = vld [vmem:[%s2350_s3 + $0x78] sm:$0xff] (!%p242_p9)  ;;  %v901_v51 = vld [vmem:[%s2352_s5] sm:$0xff] (!%p242_p9)  ;;  %s1117_s17 = sshll.u32 (!%p242_p9), %s2256_s14, 4  ;;  %s2298_s19 = scalar_lea.hbm (!%p242_p9), %s2354_s7, %s1209_s16  ;;  %s2300_s17 = int_to_ptr.vmem [resolvable:$true] %s1117_s17 }
  0x14   : > { %1551 = vmatpush3.bf16.msra.mxu0 (!%p242_p9), %v1550_v7  ;;  %1603 = vmatpush3.bf16.msra.mxu1 (!%p242_p9), %v1550_v7  ;;  %v1574_v50 = vpack.c.bf16 (!%p242_p9), %v638_v49, %v637_v48  ;;  %v902_v52 = vld [vmem:[%s2352_s5 + $0x8] sm:$0xff] (!%p242_p9)  ;;  %v903_v53 = vld [vmem:[%s2352_s5 + $0x10] sm:$0xff] (!%p242_p9)  ;;  %v904_v55 = vld [vmem:[%s2352_s5 + $0x18] sm:$0xff] (!%p242_p9)  ;;  %s1725_s20 = scalar_lea.vmem (!%p242_p9), %s2300_s17, 2432 }
  0x15   : > { %s2362_s21 = smov (!%p274_p10, %s273_s21), 37  ;;  %1552 = vmatprep.subr.bf16.mxu1 %v1789_v3  ;;  %1576 = vmatprep.subr.bf16.mxu0 %v1789_v3  ;;  %v1577_v54 = vpack.c.bf16 %v902_v52, %v901_v51  ;;  %v1580_v56 = vpack.c.bf16 %v904_v55, %v903_v53  ;;  %v905_v57 = vld [vmem:[%s2352_s5 + $0x20] sm:$0xff]  ;;  %v906_v58 = vld [vmem:[%s2352_s5 + $0x28] sm:$0xff]  ;;  %v907_v60 = vld [vmem:[%s2352_s5 + $0x30] sm:$0xff]  ;;  %p1726_p11 = scmp.ne.s32.totalorder %s2300_s17, %s1725_s20 }
  0x16   : > { %s1183_s9 = sshll.u32 %s2362_s21, 3  ;;  %v1583_v59 = vpack.c.bf16 %v906_v58, %v905_v57  ;;  %v908_v61 = vld [vmem:[%s2352_s5 + $0x38] sm:$0xff]  ;;  %v2073_v63 = vld [vmem:[%s2349_s2] ss:$0 sm:$0xff]  ;;  %s1792_s21 = smov [#allocation2]  }
  0x17   : > { %s1913_s15 = scalar_lea.vmem %s2347_s0, %s1183_s9  ;;  %v1586_v62 = vpack.c.bf16 %v908_v61, %v907_v60  ;;  %p1727_p12 = pnand %p1726_p11, %p1873_p5 }
  0x18   : > { %v280_v10 = vld [vmem:[%s1913_s15] sm:$0xff]  ;;  %v281_v14 = vld [vmem:[%s1913_s15 + $0x8] sm:$0xff]  ;;  %v290_v15 = vld [vmem:[%s1913_s15 + $0x50] sm:$0xff]  ;;  %s1729_s22 = sshll.u32 %s1792_s21, 4  ;;  %s1730_s22 = int_to_ptr.vmem [resolvable:$false] %s1729_s22 }
  0x19   : > { %1312 = vmatmul.mubr.msk.f32.vlgmr.msra.gmra.mrb[0].mxu0 %vm310_vm1, %v280_v10  ;;  %1342 = vmatmul.mubr.msk.f32.vlgmr.msra.gmra.mrb[0].mxu1 %vm310_vm1, %v290_v15  ;;  %v291_v16 = vld [vmem:[%s1913_s15 + $0x58] sm:$0xff]  ;;  %v282_v20 = vld [vmem:[%s1913_s15 + $0x10] sm:$0xff]  ;;  %v292_v21 = vld [vmem:[%s1913_s15 + $0x60] sm:$0xff]  ;;  %p1728_p13 = pneg %p1727_p12  ;;  %s1731_s23 = scalar_lea.vmem %s1730_s22, 4864 }
  0x1a   : > { %1314 = vmatprep.mubr.msk.f32.mxu0 %vm1790_vm0, %v1791_v6  ;;  %1344 = vmatprep.mubr.msk.f32.mxu1 %vm1790_vm0, %v1791_v6  ;;  %v283_v25 = vld [vmem:[%s1913_s15 + $0x18] sm:$0xff]  ;;  %v293_v26 = vld [vmem:[%s1913_s15 + $0x68] sm:$0xff]  ;;  %v284_v28 = vld [vmem:[%s1913_s15 + $0x20] sm:$0xff]  ;;  %p1732_p0 = scmp.lt.s32.totalorder %s2300_s17, %s1730_s22  ;;  %p1733_p1 = scmp.lt.s32.totalorder %s1731_s23, %s1725_s20 }
  0x1b   : > { %1554 = vmatpush3.bf16.msra.mxu1 %v1553_v11  ;;  %v294_v29 = vld [vmem:[%s1913_s15 + $0x70] sm:$0xff]  ;;  %v285_v30 = vld [vmem:[%s1913_s15 + $0x28] sm:$0xff]  ;;  %v295_v31 = vld [vmem:[%s1913_s15 + $0x78] sm:$0xff]  ;;  %1578 = vmatpush3.bf16.msra.mxu0 %v1577_v54 }
  0x1c   : > { %1555 = vmatprep.subr.bf16.mxu1 %v1789_v3  ;;  %v286_v32 = vld [vmem:[%s1913_s15 + $0x30] sm:$0xff]  ;;  %v296_v33 = vld [vmem:[%s1913_s15 + $0x80] sm:$0xff]  ;;  %v287_v34 = vld [vmem:[%s1913_s15 + $0x38] sm:$0xff]  ;;  %1579 = vmatprep.subr.bf16.mxu0 %v1789_v3  ;;  %p1734_p2 = por %p1733_p1, %p1732_p0 }
  0x1d   : > { %1315 = vmatmul.mubr.msk.f32.gmra.mrb[2].mxu0 %vm310_vm1, %v281_v14  ;;  %1345 = vmatmul.mubr.msk.f32.gmra.mrb[2].mxu1 %vm310_vm1, %v291_v16  ;;  %v297_v35 = vld [vmem:[%s1913_s15 + $0x88] sm:$0xff]  ;;  %v288_v36 = vld [vmem:[%s1913_s15 + $0x40] sm:$0xff]  ;;  %v298_v37 = vld [vmem:[%s1913_s15 + $0x90] sm:$0xff] }
  0x1e   : > { %1317 = vmatprep.mubr.msk.f32.mxu0 %vm1790_vm0, %v1791_v6  ;;  %1347 = vmatprep.mubr.msk.f32.mxu1 %vm1790_vm0, %v1791_v6  ;;  %v289_v38 = vld [vmem:[%s1913_s15 + $0x48] sm:$0xff]  ;;  %p1735_p3 = pnand %p1734_p2, %p1728_p13 }
  0x1f   : > { %1557 = vmatpush3.bf16.msra.mxu1 %v1556_v17  ;;  %1581 = vmatpush3.bf16.msra.mxu0 %v1580_v56 }
  0x20   : > { %1558 = vmatprep.subr.bf16.mxu1 %v1789_v3  ;;  %1582 = vmatprep.subr.bf16.mxu0 %v1789_v3 }
  0x21   : > { %1318 = vmatmul.mubr.msk.f32.gmra.mrb[4].mxu0 %vm310_vm1, %v282_v20  ;;  %1348 = vmatmul.mubr.msk.f32.gmra.mrb[4].mxu1 %vm310_vm1, %v292_v21 }
  0x22   : > { %1320 = vmatprep.mubr.msk.f32.mxu0 %vm1790_vm0, %v1791_v6  ;;  %1350 = vmatprep.mubr.msk.f32.mxu1 %vm1790_vm0, %v1791_v6 }
  0x23   : > { %1560 = vmatpush3.bf16.msra.mxu1 %v1559_v22  ;;  %1584 = vmatpush3.bf16.msra.mxu0 %v1583_v59 }
  0x24   : > { %1561 = vmatprep.subr.bf16.mxu1 %v1789_v3  ;;  %1585 = vmatprep.subr.bf16.mxu0 %v1789_v3 }
  0x25   : > { %1321 = vmatmul.mubr.msk.f32.gmra.mrb[6].mxu0 %vm310_vm1, %v283_v25  ;;  %1351 = vmatmul.mubr.msk.f32.gmra.mrb[6].mxu1 %vm310_vm1, %v293_v26 }
  0x26   : > { %1323 = vmatprep.mubr.msk.f32.mxu0 %vm1790_vm0, %v1791_v6  ;;  %1353 = vmatprep.mubr.msk.f32.mxu1 %vm1790_vm0, %v1791_v6 }
  0x27   : > { %1563 = vmatpush3.bf16.msra.mxu1 %v1562_v27  ;;  %1587 = vmatpush3.bf16.msra.mxu0 %v1586_v62 }
  0x28   : > { %1564 = vmatprep.subr.bf16.mxu1 %v1789_v3  ;;  %1588 = vmatprep.subr.bf16.mxu0 %v1789_v3 }
  0x29   : > { %1324 = vmatmul.mubr.msk.f32.gmra.mrb[8].mxu0 %vm310_vm1, %v284_v28  ;;  %1354 = vmatmul.mubr.msk.f32.gmra.mrb[8].mxu1 %vm310_vm1, %v294_v29 }
  0x2a   : > { %1326 = vmatprep.mubr.msk.f32.mxu0 %vm1790_vm0, %v1791_v6  ;;  %1356 = vmatprep.mubr.msk.f32.mxu1 %vm1790_vm0, %v1791_v6 }
  0x2b   : > { %1566 = vmatpush3.bf16.msra.mxu1 %v1565_v41 }
  0x2c   : > { %1567 = vmatprep.subr.bf16.mxu1 %v1789_v3 }
  0x2d   : > { %1327 = vmatmul.mubr.msk.f32.gmra.mrb[10].mxu0 %vm310_vm1, %v285_v30  ;;  %1357 = vmatmul.mubr.msk.f32.gmra.mrb[10].mxu1 %vm310_vm1, %v295_v31 }
  0x2e   : > { %1329 = vmatprep.mubr.msk.f32.mxu0 %vm1790_vm0, %v1791_v6  ;;  %1359 = vmatprep.mubr.msk.f32.mxu1 %vm1790_vm0, %v1791_v6 }
  0x2f   : > { %1569 = vmatpush3.bf16.msra.mxu1 %v1568_v44 }
  0x30   : > { %1570 = vmatprep.subr.bf16.mxu1 %v1789_v3 }
  0x31   : > { %1330 = vmatmul.mubr.msk.f32.gmra.mrb[12].mxu0 %vm310_vm1, %v286_v32  ;;  %1360 = vmatmul.mubr.msk.f32.gmra.mrb[12].mxu1 %vm310_vm1, %v296_v33 }
  0x32   : > { %1332 = vmatprep.mubr.msk.f32.mxu0 %vm1790_vm0, %v1791_v6  ;;  %1362 = vmatprep.mubr.msk.f32.mxu1 %vm1790_vm0, %v1791_v6 }
  0x33   : > { %1572 = vmatpush3.bf16.msra.mxu1 %v1571_v47 }
  0x34   : > { %1573 = vmatprep.subr.bf16.mxu1 %v1789_v3 }
  0x35   : > { %1333 = vmatmul.mubr.msk.f32.gmra.mrb[14].mxu0 %vm310_vm1, %v287_v34  ;;  %1363 = vmatmul.mubr.msk.f32.gmra.mrb[14].mxu1 %vm310_vm1, %v297_v35 }
  0x36   : > { %1335 = vmatprep.mubr.msk.f32.mxu0 %vm1790_vm0, %v1791_v6  ;;  %1365 = vmatprep.mubr.msk.f32.mxu1 %vm1790_vm0, %v1791_v6 }
  0x37   : > { %1575 = vmatpush3.bf16.msra.mxu1 %v1574_v50 }
  0x39   : > { %1336 = vmatmul.mubr.msk.f32.gmra.mrb[16].mxu0 %vm310_vm1, %v288_v36  ;;  %1366 = vmatmul.mubr.msk.f32.gmra.mrb[16].mxu1 %vm310_vm1, %v298_v37 }
  0x3a   : > { %1338 = vmatprep.mubr.msk.f32.mxu0 %vm1790_vm0, %v1791_v6  ;;  %1400 = vmatprep.mubr.msk.f32.mxu1 %vm1790_vm0, %v1791_v6 }
  0x3d   : > { %1339 = vmatmul.mubr.msk.f32.gmra.mrb[18].mxu0 %vm310_vm1, %v289_v38 }
  0x3e   : > { %1489 = vmatprep.mubr.msk.f32.mxu0 %vm1790_vm0, %v1791_v6 }
  0xec   : > { %v434_v0 = vpop.f32.mrb[0].mxu0  ;;  %v2076_v4 = vpop.f32.mrb[0].mxu1 }
  0xed   : > { %v435_v1 = vadd.f32 %v2073_v63, %v434_v0  ;;  %v1313_v2 = vpop.f32.mrb[1].mxu0  ;;  %v1343_v7 = vpop.f32.mrb[1].mxu1 }
  0xef   : > { %v547_v5 = vmul.f32 0.70710677, %v435_v1  ;;  %v528_v27 = vmul.f32 0.5, %v435_v1 }
  0xf0   : > { %v439_v8 = vpop.f32.mrb[2].mxu0  ;;  %v2079_v11 = vpop.f32.mrb[2].mxu1 }
  0xf1   : > { %1649 = verf.f32 %v547_v5  ;;  %v440_v9 = vadd.f32 %v2073_v63, %v439_v8  ;;  %v1316_v10 = vpop.f32.mrb[3].mxu0  ;;  %v1346_v13 = vpop.f32.mrb[3].mxu1 }
  0xf3   : > { %v548_v12 = vmul.f32 0.70710677, %v440_v9  ;;  %v529_v37 = vmul.f32 0.5, %v440_v9 }
  0xf4   : > { %v444_v14 = vpop.f32.mrb[4].mxu0  ;;  %v2082_v17 = vpop.f32.mrb[4].mxu1 }
  0xf5   : > { %1651 = verf.f32 %v548_v12  ;;  %v445_v15 = vadd.f32 %v2073_v63, %v444_v14  ;;  %v1319_v16 = vpop.f32.mrb[5].mxu0  ;;  %v1349_v19 = vpop.f32.mrb[5].mxu1  ;;  %v485_v12 = vadd.f32 %v2073_v63, %v2076_v4 }
  0xf7   : > { %v549_v18 = vmul.f32 0.70710677, %v445_v15  ;;  %v530_v47 = vmul.f32 0.5, %v445_v15  ;;  %v557_v4 = vmul.f32 0.70710677, %v485_v12 }
  0xf8   : > { %v449_v20 = vpop.f32.mrb[6].mxu0  ;;  %v2085_v23 = vpop.f32.mrb[6].mxu1 }
  0xf9   : > { %1653 = verf.f32 %v549_v18  ;;  %v450_v21 = vadd.f32 %v2073_v63, %v449_v20  ;;  %v1322_v22 = vpop.f32.mrb[7].mxu0  ;;  %v1352_v26 = vpop.f32.mrb[7].mxu1 }
  0xfb   : > { %v1650_v24 = vpop.eup %1649  ;;  %v550_v25 = vmul.f32 0.70710677, %v450_v21  ;;  %v531_v58 = vmul.f32 0.5, %v450_v21 }
  0xfc   : > { %v585_v28 = vadd.f32 1.0, %v1650_v24  ;;  %v454_v29 = vpop.f32.mrb[8].mxu0  ;;  %v2088_v33 = vpop.f32.mrb[8].mxu1 }
  0xfd   : > { %1655 = verf.f32 %v550_v25  ;;  %v455_v30 = vadd.f32 %v2073_v63, %v454_v29  ;;  %v1325_v31 = vpop.f32.mrb[9].mxu0  ;;  %v1355_v36 = vpop.f32.mrb[9].mxu1 }
  0xfe   : > { %v604_v32 = vmul.f32 %v585_v28, %v528_v27  ;;  %v490_v27 = vadd.f32 %v2073_v63, %v2079_v11 }
  0xff   : > { %v1652_v34 = vpop.eup %1651  ;;  %v551_v35 = vmul.f32 0.70710677, %v455_v30  ;;  %v532_v9 = vmul.f32 0.5, %v455_v30 }
 0x100   : > { %v586_v38 = vadd.f32 1.0, %v1652_v34  ;;  %v459_v39 = vpop.f32.mrb[10].mxu0  ;;  %1401 = vmatmul.mubr.f32.vlgmr.msra.gmra.mrb[18].mxu1 %v604_v32  ;;  %v2093_v43 = vpop.f32.mrb[10].mxu1  ;;  %v558_v36 = vmul.f32 0.70710677, %v490_v27 }
 0x101   : > { %1657 = verf.f32 %v551_v35  ;;  %v460_v40 = vadd.f32 %v2073_v63, %v459_v39  ;;  %v1328_v41 = vpop.f32.mrb[11].mxu0  ;;  %1403 = vmatprep.mubr.msk.f32.mxu1 %vm1790_vm0, %v1791_v6  ;;  %v1358_v46 = vpop.f32.mrb[11].mxu1 }
 0x102   : > { %v605_v42 = vmul.f32 %v586_v38, %v529_v37  ;;  %v495_v37 = vadd.f32 %v2073_v63, %v2082_v17 }
 0x103   : > { %v1654_v44 = vpop.eup %1653  ;;  %v552_v45 = vmul.f32 0.70710677, %v460_v40  ;;  %v533_v24 = vmul.f32 0.5, %v460_v40 }
 0x104   : > { %v587_v48 = vadd.f32 1.0, %v1654_v44  ;;  %v464_v49 = vpop.f32.mrb[12].mxu0  ;;  %1404 = vmatmul.mubr.f32.gmra.mrb[20].mxu1 %v605_v42  ;;  %v514_v53 = vpop.f32.mrb[12].mxu1  ;;  %v559_v41 = vmul.f32 0.70710677, %v495_v37  ;;  %v500_v42 = vadd.f32 %v2073_v63, %v2085_v23 }
 0x105   : > { %1659 = verf.f32 %v552_v45  ;;  %v465_v50 = vadd.f32 %v2073_v63, %v464_v49  ;;  %v1331_v51 = vpop.f32.mrb[13].mxu0  ;;  %1406 = vmatprep.mubr.msk.f32.mxu1 %vm1790_vm0, %v1791_v6  ;;  %v2099_v56 = vadd.f32 %v2073_v63, %v514_v53  ;;  %v1361_v57 = vpop.f32.mrb[13].mxu1 }
 0x106   : > { %v606_v52 = vmul.f32 %v587_v48, %v530_v47  ;;  %v560_v47 = vmul.f32 0.70710677, %v500_v42  ;;  %v505_v48 = vadd.f32 %v2073_v63, %v2088_v33 }
 0x107   : > { %v1656_v54 = vpop.eup %1655  ;;  %v553_v55 = vmul.f32 0.70710677, %v465_v50  ;;  %v534_v34 = vmul.f32 0.5, %v465_v50 }
 0x108   : > { %v588_v59 = vadd.f32 1.0, %v1656_v54  ;;  %v469_v60 = vpop.f32.mrb[14].mxu0  ;;  %1407 = vmatmul.mubr.f32.gmra.mrb[22].mxu1 %v606_v52  ;;  %v519_v1 = vpop.f32.mrb[14].mxu1  ;;  %v561_v53 = vmul.f32 0.70710677, %v505_v48  ;;  %v510_v54 = vadd.f32 %v2073_v63, %v2093_v43  ;;  %v540_v43 = vmul.f32 0.5, %v495_v37 }
 0x109   : > { %1661 = verf.f32 %v553_v55  ;;  %v470_v61 = vadd.f32 %v2073_v63, %v469_v60  ;;  %v1334_v62 = vpop.f32.mrb[15].mxu0  ;;  %1409 = vmatprep.mubr.msk.f32.mxu1 %vm1790_vm0, %v1791_v6  ;;  %v2105_v7 = vadd.f32 %v2073_v63, %v519_v1  ;;  %v1364_v8 = vpop.f32.mrb[15].mxu1  ;;  %v538_v55 = vmul.f32 0.5, %v485_v12  ;;  %v910_v37 = vld [vmem:[%s2352_s5 + $0x48] sm:$0xff] }
 0x10a   : > { %v607_v0 = vmul.f32 %v588_v59, %v531_v58  ;;  %v562_v59 = vmul.f32 0.70710677, %v510_v54  ;;  %v539_v60 = vmul.f32 0.5, %v490_v27 }
 0x10b   : > { %v1658_v2 = vpop.eup %1657  ;;  %v554_v5 = vmul.f32 0.70710677, %v470_v61  ;;  %v535_v39 = vmul.f32 0.5, %v470_v61  ;;  %v564_v8 = vmul.f32 0.70710677, %v2105_v7 }
 0x10c   : > { %v589_v10 = vadd.f32 1.0, %v1658_v2  ;;  %v474_v13 = vpop.f32.mrb[16].mxu0  ;;  %1410 = vmatmul.mubr.f32.gmra.mrb[24].mxu1 %v607_v0  ;;  %v524_v18 = vpop.f32.mrb[16].mxu1 }
 0x10d   : > { %1663 = verf.f32 %v554_v5  ;;  %v475_v14 = vadd.f32 %v2073_v63, %v474_v13  ;;  %v1337_v15 = vpop.f32.mrb[17].mxu0  ;;  %1412 = vmatprep.mubr.msk.f32.mxu1 %vm1790_vm0, %v1791_v6  ;;  %v2113_v21 = vadd.f32 %v2073_v63, %v524_v18  ;;  %v1367_v22 = vpop.f32.mrb[17].mxu1 }
 0x10e   : > { %v608_v16 = vmul.f32 %v589_v10, %v532_v9  ;;  %v541_v9 = vmul.f32 0.5, %v500_v42  ;;  %v542_v15 = vmul.f32 0.5, %v505_v48 }
 0x10f   : > { %v1660_v19 = vpop.eup %1659  ;;  %v555_v20 = vmul.f32 0.70710677, %v475_v14  ;;  %v536_v17 = vmul.f32 0.5, %v475_v14  ;;  %v565_v14 = vmul.f32 0.70710677, %v2113_v21 }
 0x110   : > { %v590_v25 = vadd.f32 1.0, %v1660_v19  ;;  %v479_v26 = vpop.f32.mrb[18].mxu0  ;;  %1413 = vmatmul.mubr.f32.gmra.mrb[26].mxu1 %v608_v16 }
 0x111   : > { %1665 = verf.f32 %v555_v20  ;;  %v480_v28 = vadd.f32 %v2073_v63, %v479_v26  ;;  %v1340_v29 = vpop.f32.mrb[19].mxu0  ;;  %1415 = vmatprep.mubr.msk.f32.mxu1 %vm1790_vm0, %v1791_v6  ;;  %v563_v63 = vmul.f32 0.70710677, %v2099_v56  ;;  %v543_v20 = vmul.f32 0.5, %v510_v54 }
 0x112   : > { %v609_v30 = vmul.f32 %v590_v25, %v533_v24  ;;  %1667 = verf.f32 %v557_v4  ;;  %v544_v4 = vmul.f32 0.5, %v2099_v56  ;;  %v545_v29 = vmul.f32 0.5, %v2105_v7  ;;  %v909_v7 = vld [vmem:[%s2352_s5 + $0x40] sm:$0xff] }
 0x113   : > { %v1662_v31 = vpop.eup %1661  ;;  %v556_v32 = vmul.f32 0.70710677, %v480_v28  ;;  %v537_v23 = vmul.f32 0.5, %v480_v28 }
 0x114   : > { %v591_v35 = vadd.f32 1.0, %v1662_v31  ;;  %1416 = vmatmul.mubr.f32.gmra.mrb[28].mxu1 %v609_v30 }
 0x115   : > { %1669 = verf.f32 %v556_v32  ;;  %1418 = vmatprep.mubr.msk.f32.mxu1 %vm1790_vm0, %v1791_v6 }
 0x116   : > { %v610_v11 = vmul.f32 %v591_v35, %v534_v34  ;;  %1671 = verf.f32 %v558_v36  ;;  %v546_v34 = vmul.f32 0.5, %v2113_v21  ;;  %v911_v21 = vld [vmem:[%s2352_s5 + $0x50] sm:$0xff] }
 0x117   : > { %v1664_v38 = vpop.eup %1663  ;;  %1673 = verf.f32 %v559_v41  ;;  %v914_v41 = vld [vmem:[%s2352_s5 + $0x68] sm:$0xff] }
 0x118   : > { %v592_v40 = vadd.f32 1.0, %v1664_v38  ;;  %1419 = vmatmul.mubr.f32.gmra.mrb[30].mxu1 %v610_v11  ;;  %1675 = verf.f32 %v560_v47  ;;  %v1589_v11 = vpack.c.bf16 %v910_v37, %v909_v7  ;;  %v912_v38 = vld [vmem:[%s2352_s5 + $0x58] sm:$0xff] }
 0x119   : > { %1421 = vmatprep.mubr.msk.f32.mxu1 %vm1790_vm0, %v1791_v6  ;;  %1677 = verf.f32 %v561_v53 }
 0x11a   : > { %v611_v44 = vmul.f32 %v592_v40, %v535_v39  ;;  %1679 = verf.f32 %v562_v59  ;;  %1590 = vmatpush3.bf16.msra.mxu0 %v1589_v11  ;;  %v1592_v39 = vpack.c.bf16 %v912_v38, %v911_v21  ;;  %v913_v40 = vld [vmem:[%s2352_s5 + $0x60] sm:$0xff] }
 0x11b   : > { %v1666_v45 = vpop.eup %1665  ;;  %1681 = verf.f32 %v563_v63  ;;  %1591 = vmatprep.subr.bf16.mxu0 %v1789_v3  ;;  %v1595_v42 = vpack.c.bf16 %v914_v41, %v913_v40 }
 0x11c   : > { %v593_v46 = vadd.f32 1.0, %v1666_v45  ;;  %1422 = vmatmul.mubr.f32.gmra.mrb[32].mxu1 %v611_v44  ;;  %v1668_v49 = vpop.eup %1667  ;;  %1683 = verf.f32 %v564_v8  ;;  %v915_v44 = vld [vmem:[%s2352_s5 + $0x70] sm:$0xff]  ;;  %v916_v45 = vld [vmem:[%s2352_s5 + $0x78] sm:$0xff] }
 0x11d   : > { %1424 = vmatprep.mubr.msk.f32.mxu1 %vm1790_vm0, %v1791_v6  ;;  %v595_v57 = vadd.f32 1.0, %v1668_v49  ;;  %1685 = verf.f32 %v565_v14 }
 0x11e   : > { %v612_v50 = vmul.f32 %v593_v46, %v536_v17  ;;  %1593 = vmatpush3.bf16.msra.mxu0 %v1592_v39  ;;  %v1598_v17 = vpack.c.bf16 %v916_v45, %v915_v44  ;;  %v2190_v46 = vld [vmem:[%s2351_s4] ss:$0 sm:$0xff] }
 0x11f   : > { %v1670_v51 = vpop.eup %1669  ;;  %v614_v62 = vmul.f32 %v595_v57, %v538_v55  ;;  %1594 = vmatprep.subr.bf16.mxu0 %v1789_v3 }
 0x120   : > { %v594_v52 = vadd.f32 1.0, %v1670_v51  ;;  %1425 = vmatmul.mubr.f32.gmra.mrb[34].mxu1 %v612_v50  ;;  %v1672_v58 = vpop.eup %1671 }
 0x121   : > { %1427 = vmatprep.mubr.msk.f32.mxu1 %vm1790_vm0, %v1791_v6  ;;  %v596_v61 = vadd.f32 1.0, %v1672_v58  ;;  %v1674_v0 = vpop.eup %1673 }
 0x122   : > { %v613_v33 = vmul.f32 %v594_v52, %v537_v23  ;;  %v597_v1 = vadd.f32 1.0, %v1674_v0  ;;  %v1676_v5 = vpop.eup %1675  ;;  %1596 = vmatpush3.bf16.msra.mxu0 %v1595_v42 }
 0x123   : > { %v615_v2 = vmul.f32 %v596_v61, %v539_v60  ;;  %v598_v10 = vadd.f32 1.0, %v1676_v5  ;;  %v1678_v13 = vpop.eup %1677  ;;  %1597 = vmatprep.subr.bf16.mxu0 %v1789_v3 }
 0x124   : > { %1428 = vmatmul.mubr.f32.gmra.mrb[36].mxu1 %v613_v33  ;;  %v616_v12 = vmul.f32 %v597_v1, %v540_v43  ;;  %v599_v16 = vadd.f32 1.0, %v1678_v13  ;;  %v1680_v19 = vpop.eup %1679 }
 0x125   : > { %1430 = vmatprep.mubr.msk.f32.mxu1 %vm1790_vm0, %v1791_v6  ;;  %v617_v18 = vmul.f32 %v598_v10, %v541_v9  ;;  %v600_v22 = vadd.f32 1.0, %v1680_v19  ;;  %v1682_v25 = vpop.eup %1681 }
 0x126   : > { %v618_v24 = vmul.f32 %v599_v16, %v542_v15  ;;  %v601_v26 = vadd.f32 1.0, %v1682_v25  ;;  %v1684_v28 = vpop.eup %1683  ;;  %1599 = vmatpush3.bf16.msra.mxu0 %v1598_v17 }
 0x127   : > { %v619_v27 = vmul.f32 %v600_v22, %v543_v20  ;;  %v602_v30 = vadd.f32 1.0, %v1684_v28  ;;  %v1686_v32 = vpop.eup %1685 }
 0x128   : > { %1431 = vmatmul.mubr.f32.gmra.mrb[38].mxu1 %v614_v62  ;;  %v620_v31 = vmul.f32 %v601_v26, %v544_v4  ;;  %v603_v35 = vadd.f32 1.0, %v1686_v32 }
 0x129   : > { %1433 = vmatprep.mubr.msk.f32.mxu1 %vm1790_vm0, %v1791_v6  ;;  %v621_v56 = vmul.f32 %v602_v30, %v545_v29 }
 0x12a   : > { %v622_v36 = vmul.f32 %v603_v35, %v546_v34 }
 0x12c   : > { %1434 = vmatmul.mubr.f32.gmra.mrb[40].mxu1 %v615_v2 }
 0x12d   : > { %1436 = vmatprep.mubr.msk.f32.mxu1 %vm1790_vm0, %v1791_v6 }
 0x130   : > { %1437 = vmatmul.mubr.f32.gmra.mrb[42].mxu1 %v616_v12 }
 0x131   : > { %1439 = vmatprep.mubr.msk.f32.mxu1 %vm1790_vm0, %v1791_v6 }
 0x134   : > { %1440 = vmatmul.mubr.f32.gmra.mrb[44].mxu1 %v617_v18 }
 0x135   : > { %1442 = vmatprep.mubr.msk.f32.mxu1 %vm1790_vm0, %v1791_v6 }
 0x138   : > { %1443 = vmatmul.mubr.f32.gmra.mrb[46].mxu1 %v618_v24 }
 0x139   : > { %1445 = vmatprep.mubr.msk.f32.mxu1 %vm1790_vm0, %v1791_v6 }
 0x13c   : > { %1446 = vmatmul.mubr.f32.gmra.mrb[48].mxu1 %v619_v27 }
 0x13d   : > { %1448 = vmatprep.mubr.msk.f32.mxu1 %vm1790_vm0, %v1791_v6 }
 0x140   : > { %1449 = vmatmul.mubr.f32.gmra.mrb[50].mxu1 %v620_v31 }
 0x141   : > { %1451 = vmatprep.mubr.msk.f32.mxu1 %vm1790_vm0, %v1791_v6 }
 0x144   : > { %1452 = vmatmul.mubr.f32.gmra.mrb[52].mxu1 %v621_v56 }
 0x145   : > { %1454 = vmatprep.mubr.msk.f32.mxu1 %vm1790_vm0, %v1791_v6 }
 0x148   : > { %1455 = vmatmul.mubr.f32.gmra.mrb[54].mxu1 %v622_v36 }
 0x1d3   : > { %v712_v47 = vpop.f32.mrb[18].mxu1 }
 0x1d4   : > { %v713_v48 = vadd.f32 %v2190_v46, %v712_v47  ;;  %v1402_v49 = vpop.f32.mrb[19].mxu1 }
 0x1d6   : > { %v825_v3 = vmul.f32 0.70710677, %v713_v48  ;;  %v806_v62 = vmul.f32 0.5, %v713_v48 }
 0x1d7   : > { %v717_v50 = vpop.f32.mrb[20].mxu1 }
 0x1d8   : > { %1687 = verf.f32 %v825_v3  ;;  %v718_v51 = vadd.f32 %v2190_v46, %v717_v50  ;;  %v1405_v23 = vpop.f32.mrb[21].mxu1 }
 0x1da   : > { %v826_v52 = vmul.f32 0.70710677, %v718_v51  ;;  %v807_v9 = vmul.f32 0.5, %v718_v51 }
 0x1db   : > { %v722_v53 = vpop.f32.mrb[22].mxu1 }
 0x1dc   : > { %1689 = verf.f32 %v826_v52  ;;  %v723_v54 = vadd.f32 %v2190_v46, %v722_v53  ;;  %v1408_v55 = vpop.f32.mrb[23].mxu1 }
 0x1de   : > { %v827_v57 = vmul.f32 0.70710677, %v723_v54  ;;  %v808_v19 = vmul.f32 0.5, %v723_v54 }
 0x1df   : > { %v727_v33 = vpop.f32.mrb[24].mxu1 }
 0x1e0   : > { %1691 = verf.f32 %v827_v57  ;;  %v728_v58 = vadd.f32 %v2190_v46, %v727_v33  ;;  %v1411_v59 = vpop.f32.mrb[25].mxu1 }
 0x1e2   : > { %v1688_v60 = vpop.eup %1687  ;;  %v828_v61 = vmul.f32 0.70710677, %v728_v58  ;;  %v809_v28 = vmul.f32 0.5, %v728_v58 }
 0x1e3   : > { %v863_v0 = vadd.f32 1.0, %v1688_v60  ;;  %v732_v63 = vpop.f32.mrb[26].mxu1 }
 0x1e4   : > { %1693 = verf.f32 %v828_v61  ;;  %v733_v43 = vadd.f32 %v2190_v46, %v732_v63  ;;  %v1414_v1 = vpop.f32.mrb[27].mxu1 }
 0x1e5   : > { %v882_v2 = vmul.f32 %v863_v0, %v806_v62 }
 0x1e6   : > { %v1690_v5 = vpop.eup %1689  ;;  %v829_v8 = vmul.f32 0.70710677, %v733_v43  ;;  %v810_v36 = vmul.f32 0.5, %v733_v43 }
 0x1e7   : > { %v864_v10 = vadd.f32 1.0, %v1690_v5  ;;  %v737_v12 = vpop.f32.mrb[28].mxu1  ;;  %1490 = vmatmul.mubr.f32.vlgmr.msra.gmra.mrb[20].mxu0 %v882_v2 }
 0x1e8   : > { %1695 = verf.f32 %v829_v8  ;;  %v738_v13 = vadd.f32 %v2190_v46, %v737_v12  ;;  %v1417_v14 = vpop.f32.mrb[29].mxu1  ;;  %1492 = vmatprep.mubr.msk.f32.mxu0 %vm1790_vm0, %v1791_v6 }
 0x1e9   : > { %v883_v15 = vmul.f32 %v864_v10, %v807_v9 }
 0x1ea   : > { %v1692_v16 = vpop.eup %1691  ;;  %v830_v18 = vmul.f32 0.70710677, %v738_v13  ;;  %v811_v41 = vmul.f32 0.5, %v738_v13 }
 0x1eb   : > { %v865_v20 = vadd.f32 1.0, %v1692_v16  ;;  %v742_v22 = vpop.f32.mrb[30].mxu1  ;;  %1493 = vmatmul.mubr.f32.gmra.mrb[22].mxu0 %v883_v15 }
 0x1ec   : > { %1697 = verf.f32 %v830_v18  ;;  %v743_v24 = vadd.f32 %v2190_v46, %v742_v22  ;;  %v1420_v25 = vpop.f32.mrb[31].mxu1  ;;  %1495 = vmatprep.mubr.msk.f32.mxu0 %vm1790_vm0, %v1791_v6 }
 0x1ed   : > { %v884_v4 = vmul.f32 %v865_v20, %v808_v19 }
 0x1ee   : > { %v1694_v26 = vpop.eup %1693  ;;  %v831_v27 = vmul.f32 0.70710677, %v743_v24  ;;  %v812_v3 = vmul.f32 0.5, %v743_v24 }
 0x1ef   : > { %v866_v29 = vadd.f32 1.0, %v1694_v26  ;;  %v747_v30 = vpop.f32.mrb[32].mxu1  ;;  %1496 = vmatmul.mubr.f32.gmra.mrb[24].mxu0 %v884_v4 }
 0x1f0   : > { %1699 = verf.f32 %v831_v27  ;;  %v748_v31 = vadd.f32 %v2190_v46, %v747_v30  ;;  %v1423_v32 = vpop.f32.mrb[33].mxu1  ;;  %1498 = vmatprep.mubr.msk.f32.mxu0 %vm1790_vm0, %v1791_v6 }
 0x1f1   : > { %v885_v34 = vmul.f32 %v866_v29, %v809_v28 }
 0x1f2   : > { %v1696_v35 = vpop.eup %1695  ;;  %v832_v56 = vmul.f32 0.70710677, %v748_v31  ;;  %v813_v57 = vmul.f32 0.5, %v748_v31 }
 0x1f3   : > { %v867_v7 = vadd.f32 1.0, %v1696_v35  ;;  %v752_v37 = vpop.f32.mrb[34].mxu1  ;;  %1499 = vmatmul.mubr.f32.gmra.mrb[26].mxu0 %v885_v34 }
 0x1f4   : > { %1701 = verf.f32 %v832_v56  ;;  %v753_v11 = vadd.f32 %v2190_v46, %v752_v37  ;;  %v1426_v21 = vpop.f32.mrb[35].mxu1  ;;  %1501 = vmatprep.mubr.msk.f32.mxu0 %vm1790_vm0, %v1791_v6 }
 0x1f5   : > { %v886_v38 = vmul.f32 %v867_v7, %v810_v36 }
 0x1f6   : > { %v1698_v39 = vpop.eup %1697  ;;  %v833_v40 = vmul.f32 0.70710677, %v753_v11  ;;  %v814_v63 = vmul.f32 0.5, %v753_v11 }
 0x1f7   : > { %v868_v42 = vadd.f32 1.0, %v1698_v39  ;;  %v757_v44 = vpop.f32.mrb[36].mxu1  ;;  %1502 = vmatmul.mubr.f32.gmra.mrb[28].mxu0 %v886_v38 }
 0x1f8   : > { %1703 = verf.f32 %v833_v40  ;;  %v758_v45 = vadd.f32 %v2190_v46, %v757_v44  ;;  %v1429_v17 = vpop.f32.mrb[37].mxu1  ;;  %1504 = vmatprep.mubr.msk.f32.mxu0 %vm1790_vm0, %v1791_v6 }
 0x1f9   : > { %v887_v47 = vmul.f32 %v868_v42, %v811_v41 }
 0x1fa   : > { %v1700_v48 = vpop.eup %1699  ;;  %v834_v49 = vmul.f32 0.70710677, %v758_v45  ;;  %v815_v12 = vmul.f32 0.5, %v758_v45 }
 0x1fb   : > { %v869_v50 = vadd.f32 1.0, %v1700_v48  ;;  %v762_v51 = vpop.f32.mrb[38].mxu1  ;;  %1505 = vmatmul.mubr.f32.gmra.mrb[30].mxu0 %v887_v47 }
 0x1fc   : > { %1705 = verf.f32 %v834_v49  ;;  %v763_v23 = vadd.f32 %v2190_v46, %v762_v51  ;;  %v1432_v52 = vpop.f32.mrb[39].mxu1  ;;  %1507 = vmatprep.mubr.msk.f32.mxu0 %vm1790_vm0, %v1791_v6 }
 0x1fd   : > { %v888_v53 = vmul.f32 %v869_v50, %v812_v3 }
 0x1fe   : > { %v1702_v54 = vpop.eup %1701  ;;  %v835_v55 = vmul.f32 0.70710677, %v763_v23  ;;  %v816_v22 = vmul.f32 0.5, %v763_v23 }
 0x1ff   : > { %v870_v33 = vadd.f32 1.0, %v1702_v54  ;;  %v767_v58 = vpop.f32.mrb[40].mxu1  ;;  %1508 = vmatmul.mubr.f32.gmra.mrb[32].mxu0 %v888_v53 }
 0x200   : > { %1707 = verf.f32 %v835_v55  ;;  %v768_v59 = vadd.f32 %v2190_v46, %v767_v58  ;;  %v1435_v60 = vpop.f32.mrb[41].mxu1  ;;  %1510 = vmatprep.mubr.msk.f32.mxu0 %vm1790_vm0, %v1791_v6 }
 0x201   : > { %v889_v61 = vmul.f32 %v870_v33, %v813_v57 }
 0x202   : > { %v1704_v62 = vpop.eup %1703  ;;  %v836_v0 = vmul.f32 0.70710677, %v768_v59  ;;  %v817_v30 = vmul.f32 0.5, %v768_v59 }
 0x203   : > { %v871_v43 = vadd.f32 1.0, %v1704_v62  ;;  %v772_v1 = vpop.f32.mrb[42].mxu1  ;;  %1511 = vmatmul.mubr.f32.gmra.mrb[34].mxu0 %v889_v61 }
 0x204   : > { %1709 = verf.f32 %v836_v0  ;;  %v773_v2 = vadd.f32 %v2190_v46, %v772_v1  ;;  %v1438_v5 = vpop.f32.mrb[43].mxu1  ;;  %1513 = vmatprep.mubr.msk.f32.mxu0 %vm1790_vm0, %v1791_v6 }
 0x205   : > { %v890_v8 = vmul.f32 %v871_v43, %v814_v63 }
 0x206   : > { %v1706_v9 = vpop.eup %1705  ;;  %v837_v10 = vmul.f32 0.70710677, %v773_v2  ;;  %v818_v37 = vmul.f32 0.5, %v773_v2 }
 0x207   : > { %v872_v13 = vadd.f32 1.0, %v1706_v9  ;;  %v777_v14 = vpop.f32.mrb[44].mxu1  ;;  %1514 = vmatmul.mubr.f32.gmra.mrb[36].mxu0 %v890_v8 }
 0x208   : > { %1711 = verf.f32 %v837_v10  ;;  %v778_v15 = vadd.f32 %v2190_v46, %v777_v14  ;;  %v1441_v16 = vpop.f32.mrb[45].mxu1  ;;  %1516 = vmatprep.mubr.msk.f32.mxu0 %vm1790_vm0, %v1791_v6 }
 0x209   : > { %v891_v18 = vmul.f32 %v872_v13, %v815_v12  ;;  %v2253_v12 = vld [vmem:[%s2353_s6] ss:$0 sm:$0xff] }
 0x20a   : > { %v1708_v19 = vpop.eup %1707  ;;  %v838_v20 = vmul.f32 0.70710677, %v778_v15  ;;  %v819_v44 = vmul.f32 0.5, %v778_v15 }
 0x20b   : > { %v873_v24 = vadd.f32 1.0, %v1708_v19  ;;  %v782_v25 = vpop.f32.mrb[46].mxu1  ;;  %1517 = vmatmul.mubr.f32.gmra.mrb[38].mxu0 %v891_v18 }
 0x20c   : > { %1713 = verf.f32 %v838_v20  ;;  %v783_v4 = vadd.f32 %v2190_v46, %v782_v25  ;;  %v1444_v26 = vpop.f32.mrb[47].mxu1  ;;  %1519 = vmatprep.mubr.msk.f32.mxu0 %vm1790_vm0, %v1791_v6 }
 0x20d   : > { %v892_v27 = vmul.f32 %v873_v24, %v816_v22 }
 0x20e   : > { %v1710_v28 = vpop.eup %1709  ;;  %v839_v29 = vmul.f32 0.70710677, %v783_v4  ;;  %v820_v51 = vmul.f32 0.5, %v783_v4 }
 0x20f   : > { %v874_v31 = vadd.f32 1.0, %v1710_v28  ;;  %v787_v32 = vpop.f32.mrb[48].mxu1  ;;  %1520 = vmatmul.mubr.f32.gmra.mrb[40].mxu0 %v892_v27 }
 0x210   : > { %1715 = verf.f32 %v839_v29  ;;  %v788_v34 = vadd.f32 %v2190_v46, %v787_v32  ;;  %v1447_v35 = vpop.f32.mrb[49].mxu1  ;;  %1522 = vmatprep.mubr.msk.f32.mxu0 %vm1790_vm0, %v1791_v6 }
 0x211   : > { %v893_v56 = vmul.f32 %v874_v31, %v817_v30 }
 0x212   : > { %v1712_v36 = vpop.eup %1711  ;;  %v840_v7 = vmul.f32 0.70710677, %v788_v34  ;;  %v821_v58 = vmul.f32 0.5, %v788_v34 }
 0x213   : > { %v875_v11 = vadd.f32 1.0, %v1712_v36  ;;  %v792_v21 = vpop.f32.mrb[50].mxu1  ;;  %1523 = vmatmul.mubr.f32.gmra.mrb[42].mxu0 %v893_v56 }
 0x214   : > { %1717 = verf.f32 %v840_v7  ;;  %v793_v38 = vadd.f32 %v2190_v46, %v792_v21  ;;  %v1450_v39 = vpop.f32.mrb[51].mxu1  ;;  %1525 = vmatprep.mubr.msk.f32.mxu0 %vm1790_vm0, %v1791_v6 }
 0x215   : > { %v894_v40 = vmul.f32 %v875_v11, %v818_v37 }
 0x216   : > { %v1714_v41 = vpop.eup %1713  ;;  %v841_v42 = vmul.f32 0.70710677, %v793_v38  ;;  %v822_v62 = vmul.f32 0.5, %v793_v38 }
 0x217   : > { %v876_v45 = vadd.f32 1.0, %v1714_v41  ;;  %v797_v17 = vpop.f32.mrb[52].mxu1  ;;  %1526 = vmatmul.mubr.f32.gmra.mrb[44].mxu0 %v894_v40 }
 0x218   : > { %1719 = verf.f32 %v841_v42  ;;  %v798_v47 = vadd.f32 %v2190_v46, %v797_v17  ;;  %v1453_v48 = vpop.f32.mrb[53].mxu1  ;;  %1528 = vmatprep.mubr.msk.f32.mxu0 %vm1790_vm0, %v1791_v6 }
 0x219   : > { %v895_v49 = vmul.f32 %v876_v45, %v819_v44 }
 0x21a   : > { %v1716_v3 = vpop.eup %1715  ;;  %v842_v50 = vmul.f32 0.70710677, %v798_v47  ;;  %v823_v43 = vmul.f32 0.5, %v798_v47 }
 0x21b   : > { %v877_v23 = vadd.f32 1.0, %v1716_v3  ;;  %v802_v52 = vpop.f32.mrb[54].mxu1  ;;  %1529 = vmatmul.mubr.f32.gmra.mrb[46].mxu0 %v895_v49 }
 0x21c   : > { %1721 = verf.f32 %v842_v50  ;;  %v803_v53 = vadd.f32 %v2190_v46, %v802_v52  ;;  %v1456_v54 = vpop.f32.mrb[55].mxu1  ;;  %1531 = vmatprep.mubr.msk.f32.mxu0 %vm1790_vm0, %v1791_v6 }
 0x21d   : > { %v896_v55 = vmul.f32 %v877_v23, %v820_v51 }
 0x21e   : > { %v1718_v57 = vpop.eup %1717  ;;  %v843_v33 = vmul.f32 0.70710677, %v803_v53  ;;  %v824_v8 = vmul.f32 0.5, %v803_v53 }
 0x21f   : > { %v878_v59 = vadd.f32 1.0, %v1718_v57  ;;  %1532 = vmatmul.mubr.f32.gmra.mrb[48].mxu0 %v896_v55 }
 0x220   : > { %1723 = verf.f32 %v843_v33  ;;  %1534 = vmatprep.mubr.msk.f32.mxu0 %vm1790_vm0, %v1791_v6 }
 0x221   : > { %v897_v60 = vmul.f32 %v878_v59, %v821_v58 }
 0x222   : > { %v1720_v61 = vpop.eup %1719 }
 0x223   : > { %v879_v0 = vadd.f32 1.0, %v1720_v61  ;;  %1535 = vmatmul.mubr.f32.gmra.mrb[50].mxu0 %v897_v60 }
 0x224   : > { %1537 = vmatprep.mubr.msk.f32.mxu0 %vm1790_vm0, %v1791_v6 }
 0x225   : > { %v898_v46 = vmul.f32 %v879_v0, %v822_v62 }
 0x226   : > { %v1722_v63 = vpop.eup %1721 }
 0x227   : > { %v880_v1 = vadd.f32 1.0, %v1722_v63  ;;  %1538 = vmatmul.mubr.f32.gmra.mrb[52].mxu0 %v898_v46 }
 0x228   : > { %1540 = vmatprep.mubr.msk.f32.mxu0 %vm1790_vm0, %v1791_v6 }
 0x229   : > { %v899_v2 = vmul.f32 %v880_v1, %v823_v43 }
 0x22a   : > { %v1724_v5 = vpop.eup %1723 }
 0x22b   : > { %v881_v9 = vadd.f32 1.0, %v1724_v5  ;;  %1541 = vmatmul.mubr.f32.gmra.mrb[54].mxu0 %v899_v2 }
 0x22c   : > { %1543 = vmatprep.mubr.msk.f32.mxu0 %vm1790_vm0, %v1791_v6 }
 0x22d   : > { %v900_v10 = vmul.f32 %v881_v9, %v824_v8 }
 0x22f   : > { %1544 = vmatmul.mubr.f32.gmra.mrb[56].mxu0 %v900_v10 }
 0x2ba   : > { %v990_v13 = vpop.f32.mrb[20].mxu0 }
 0x2bb   : > { %v991_v14 = vadd.f32 %v2253_v12, %v990_v13  ;;  %v1491_v15 = vpop.f32.mrb[21].mxu0 }
 0x2bd   : > { %1084 = vst [vmem:[%s2256_s14] sm:$0xff] %v991_v14 }
 0x2be   : > { %v995_v6 = vpop.f32.mrb[22].mxu0 }
 0x2bf   : > { %v996_v16 = vadd.f32 %v2253_v12, %v995_v6  ;;  %v1494_v18 = vpop.f32.mrb[23].mxu0 }
 0x2c1   : > { %1085 = vst [vmem:[%s2256_s14 + $0x8] sm:$0xff] %v996_v16 }
 0x2c2   : > { %v1000_v19 = vpop.f32.mrb[24].mxu0 }
 0x2c3   : > { %v1001_v20 = vadd.f32 %v2253_v12, %v1000_v19  ;;  %v1497_v22 = vpop.f32.mrb[25].mxu0 }
 0x2c5   : > { %1086 = vst [vmem:[%s2256_s14 + $0x10] sm:$0xff] %v1001_v20 }
 0x2c6   : > { %v1005_v24 = vpop.f32.mrb[26].mxu0 }
 0x2c7   : > { %v1006_v25 = vadd.f32 %v2253_v12, %v1005_v24  ;;  %v1500_v4 = vpop.f32.mrb[27].mxu0 }
 0x2c9   : > { %1087 = vst [vmem:[%s2256_s14 + $0x18] sm:$0xff] %v1006_v25 }
 0x2ca   : > { %v1010_v26 = vpop.f32.mrb[28].mxu0 }
 0x2cb   : > { %v1011_v27 = vadd.f32 %v2253_v12, %v1010_v26  ;;  %v1503_v28 = vpop.f32.mrb[29].mxu0 }
 0x2cd   : > { %1088 = vst [vmem:[%s2256_s14 + $0x20] sm:$0xff] %v1011_v27 }
 0x2ce   : > { %v1015_v29 = vpop.f32.mrb[30].mxu0 }
 0x2cf   : > { %v1016_v30 = vadd.f32 %v2253_v12, %v1015_v29  ;;  %v1506_v31 = vpop.f32.mrb[31].mxu0 }
 0x2d1   : > { %1089 = vst [vmem:[%s2256_s14 + $0x28] sm:$0xff] %v1016_v30 }
 0x2d2   : > { %v1020_v32 = vpop.f32.mrb[32].mxu0 }
 0x2d3   : > { %v1021_v34 = vadd.f32 %v2253_v12, %v1020_v32  ;;  %v1509_v35 = vpop.f32.mrb[33].mxu0 }
 0x2d5   : > { %1090 = vst [vmem:[%s2256_s14 + $0x30] sm:$0xff] %v1021_v34 }
 0x2d6   : > { %v1025_v56 = vpop.f32.mrb[34].mxu0 }
 0x2d7   : > { %v1026_v36 = vadd.f32 %v2253_v12, %v1025_v56  ;;  %v1512_v7 = vpop.f32.mrb[35].mxu0 }
 0x2d9   : > { %1091 = vst [vmem:[%s2256_s14 + $0x38] sm:$0xff] %v1026_v36 }
 0x2da   : > { %v1030_v37 = vpop.f32.mrb[36].mxu0 }
 0x2db   : > { %v1031_v11 = vadd.f32 %v2253_v12, %v1030_v37  ;;  %v1515_v21 = vpop.f32.mrb[37].mxu0 }
 0x2dd   : > { %1092 = vst [vmem:[%s2256_s14 + $0x40] sm:$0xff] %v1031_v11 }
 0x2de   : > { %v1035_v38 = vpop.f32.mrb[38].mxu0 }
 0x2df   : > { %v1036_v39 = vadd.f32 %v2253_v12, %v1035_v38  ;;  %v1518_v40 = vpop.f32.mrb[39].mxu0 }
 0x2e1   : > { %1093 = vst [vmem:[%s2256_s14 + $0x48] sm:$0xff] %v1036_v39 }
 0x2e2   : > { %v1040_v41 = vpop.f32.mrb[40].mxu0 }
 0x2e3   : > { %v1041_v42 = vadd.f32 %v2253_v12, %v1040_v41  ;;  %v1521_v44 = vpop.f32.mrb[41].mxu0 }
 0x2e5   : > { %1094 = vst [vmem:[%s2256_s14 + $0x50] sm:$0xff] %v1041_v42 }
 0x2e6   : > { %v1045_v45 = vpop.f32.mrb[42].mxu0 }
 0x2e7   : > { %v1046_v17 = vadd.f32 %v2253_v12, %v1045_v45  ;;  %v1524_v47 = vpop.f32.mrb[43].mxu0 }
 0x2e9   : > { %1095 = vst [vmem:[%s2256_s14 + $0x58] sm:$0xff] %v1046_v17 }
 0x2ea   : > { %v1050_v48 = vpop.f32.mrb[44].mxu0 }
 0x2eb   : > { %v1051_v49 = vadd.f32 %v2253_v12, %v1050_v48  ;;  %v1527_v3 = vpop.f32.mrb[45].mxu0 }
 0x2ed   : > { %1096 = vst [vmem:[%s2256_s14 + $0x60] sm:$0xff] %v1051_v49 }
 0x2ee   : > { %v1055_v50 = vpop.f32.mrb[46].mxu0 }
 0x2ef   : > { %v1056_v51 = vadd.f32 %v2253_v12, %v1055_v50  ;;  %v1530_v23 = vpop.f32.mrb[47].mxu0 }
 0x2f1   : > { %1097 = vst [vmem:[%s2256_s14 + $0x68] sm:$0xff] %v1056_v51 }
 0x2f2   : > { %v1060_v52 = vpop.f32.mrb[48].mxu0 }
 0x2f3   : > { %v1061_v53 = vadd.f32 %v2253_v12, %v1060_v52  ;;  %v1533_v54 = vpop.f32.mrb[49].mxu0 }
 0x2f5   : > { %1098 = vst [vmem:[%s2256_s14 + $0x70] sm:$0xff] %v1061_v53 }
 0x2f6   : > { %v1065_v55 = vpop.f32.mrb[50].mxu0 }
 0x2f7   : > { %v1066_v57 = vadd.f32 %v2253_v12, %v1065_v55  ;;  %v1536_v33 = vpop.f32.mrb[51].mxu0 }
 0x2f9   : > { %1099 = vst [vmem:[%s2256_s14 + $0x78] sm:$0xff] %v1066_v57 }
 0x2fa   : > { %v1070_v58 = vpop.f32.mrb[52].mxu0 }
 0x2fb   : > { %v1071_v59 = vadd.f32 %v2253_v12, %v1070_v58  ;;  %v1539_v60 = vpop.f32.mrb[53].mxu0 }
 0x2fd   : > { %1100 = vst [vmem:[%s2256_s14 + $0x80] sm:$0xff] %v1071_v59 }
 0x2fe   : > { %v1075_v61 = vpop.f32.mrb[54].mxu0 }
 0x2ff   : > { %v1076_v62 = vadd.f32 %v2253_v12, %v1075_v61  ;;  %v1542_v0 = vpop.f32.mrb[55].mxu0 }
 0x301   : > { %1101 = vst [vmem:[%s2256_s14 + $0x88] sm:$0xff] %v1076_v62 }
 0x302   : > { %v1080_v46 = vpop.f32.mrb[56].mxu0 }
 0x303   : > { %v1081_v63 = vadd.f32 %v2253_v12, %v1080_v46  ;;  %v1545_v43 = vpop.f32.mrb[57].mxu0 }
 0x305   : > { %1102 = vst [vmem:[%s2256_s14 + $0x90] sm:$0xff] %v1081_v63 }
 0x306   : > { %1738 = shalt.err (!%p1735_p3)
}
 0x307   : > { %s1739_s29 = scalar_lea.hbm %s2298_s19, 2432  ;;  %s1743_s13 = scalar_lea.hbm %s2354_s7, 4864 }
 0x308   : > { %p1740_p4 = scmp.ne.s32.totalorder %s2298_s19, %s1739_s29  ;;  %p1744_p9 = scmp.lt.u32.totalorder %s2298_s19, %s2354_s7 }
 0x309   : > { %p1745_p10 = scmp.lt.u32.totalorder %s1743_s13, %s1739_s29  ;;  %p1747_p12 = scmp.lt.u32.totalorder %s1739_s29, %s2298_s19 }
 0x30a   : > { %p1741_p7 = pnand %p1740_p4, %p1873_p5 }
 0x30b   : > { %p1746_p11 = por %p1745_p10, %p1744_p9 }
 0x30c   : > { %p1742_p8 = pneg %p1741_p7 }
 0x30d   : > { %p1748_p13 = por %p1747_p12, %p1746_p11 }
 0x30f   : > { %p1749_p0 = pnand %p1748_p13, %p1742_p8 }
 0x311   : > { %1752 = shalt.err (!%p1749_p0)
}
 0x312   : > { %s1793_s18 = smov 128   ;;  %s1794_s15 = smov 8  }
 0x313   : > { %1605 = dma.vmem_to_hbm [thread:$0]  (%p1873_p5), %s2300_s17, 2432, %s2298_s19, %s2306_s28, %s1793_s18, %s1793_s18, %s1794_s15  }
 0x314 PF: > { %p1611_p1 = scmp.ge.s32.totalorder %s1787_s27, 2  ;;  %s1132_s20 = sand.u32 1, %s1775_s24  }
 0x315   : > { %s1133_s21 = scalar_lea.sflag [#allocation3], %s1132_s20 }
 0x316   : > { %p1608_p2 = pnand %p1611_p1, %p1877_p6 }
 0x318   : > { %1770 = dma.done.wait (!%p1608_p2), %s1133_s21, 2432  }
 0x319   : > { %1772 = vsyncadd (!%p1608_p2), %s1133_s21, 4294964864  ;;  %p17_p3 = scmp.ge.s32.totalorder %s1860_s30, 4   ;;  %s2357_s24 = smov %s1779_s25 }
 0x31a   : > { %s2358_s25 = smov %s1783_s26  ;;  %s2359_s26 = smov %s1871_s10 }
 0x31b   : > { %s2360_s27 = smov %s1860_s30  ;;  %19 = sbr.rel (!%p17_p3) target bundleno = 3 (0x3), region = 83 }
 0x322   :  { %1138 = vsyncpa [#allocation3], 1 }
 0x323   :  { %1140 = vsyncpa [#allocation3 + $0x1], 1 }

</bundles_post_ra>
